<compile_context>
chip_gen: v7x
topology: tpu7x:2x2x1
jax: 0.10.0
libtpu: 0.0.40
codegen_flags: <defaults>
</compile_context>

<pallas_src>
import functools

import jax
import jax.numpy as jnp
from jax import lax
from jax.experimental import pallas as pl
from jax.experimental.pallas import tpu as pltpu


def _round_up(x, m):
    return (x + m - 1) // m * m


def _lstm_kernel(x_ref, wx_ref, wh_ref, b_ref, wfc_ref, bfc_ref, out_ref,
                 h_ref, c_ref, xproj_ref, *, seq_len, needs_mask, unroll):
    """One (batch_block, time_chunk) grid step of the LSTM recurrence.

    x_ref    : (TT, Bb, E_p)      time-chunk of embedded inputs (time-major)
    wx_ref   : (E_p, 4*H_p)       input->gates weight ([i,f,o,g] slabs)
    wh_ref   : (H_p, 4*H_p)       hidden->gates weight ([i,f,o,g] slabs)
    b_ref    : (1, 4*H_p)         b_ih + b_hh ([i,f,o,g] slabs, zero-padded)
    wfc_ref  : (H_p, C_p)         FC weight (transposed, zero-padded)
    bfc_ref  : (1, C_p)           FC bias (zero-padded)
    out_ref  : (Bb, C_p)          logits (padded), written on last time chunk
    h_ref, c_ref : (Bb, H_p) f32  VMEM scratch, persist across time chunks
    xproj_ref: (TT, Bb, 4*H_p) f32 VMEM scratch for the hoisted x-projection
    """
    t_idx = pl.program_id(1)
    n_t = pl.num_programs(1)

    TT, Bb, E = x_ref.shape
    H = h_ref.shape[1]
    G = 4 * H

    # Reset the recurrent state at the start of each batch block's time loop.
    @pl.when(t_idx == 0)
    def _():
        h_ref[...] = jnp.zeros_like(h_ref)
        c_ref[...] = jnp.zeros_like(c_ref)

    # ---- hoisted input projection: one big MXU matmul per chunk ----------
    # (TT*Bb, E_p) @ (E_p, 4*H_p) -> (TT, Bb, 4*H_p), bias folded in.
    x2d = x_ref[...].reshape(TT * Bb, E)
    xproj = jnp.dot(x2d, wx_ref[...], preferred_element_type=jnp.float32)
    xproj_ref[...] = (xproj + b_ref[...]).reshape(TT, Bb, G)

    wh = wh_ref[...]
    t0 = t_idx * TT  # global time offset of this chunk

    def step(t, carry):
        h, c = carry
        # Only the h-dependent matmul (K = H_p) remains on the serial chain.
        gates = xproj_ref[t] + jnp.dot(h.astype(wh.dtype), wh,
                                       preferred_element_type=jnp.float32)
        # [i, f, o] occupy one contiguous 3*H slab -> one sigmoid pass,
        # expressed via tanh so every transcendental is a single EUP tanh.
        ifo = 0.5 * (jnp.tanh(0.5 * gates[:, 0:3 * H]) + 1.0)
        i_g = ifo[:, 0 * H:1 * H]
        f_g = ifo[:, 1 * H:2 * H]
        o_g = ifo[:, 2 * H:3 * H]
        g_g = jnp.tanh(gates[:, 3 * H:4 * H])
        c_new = f_g * c + i_g * g_g
        h_new = o_g * jnp.tanh(c_new)
        if needs_mask:
            # Only relevant when T was padded to a multiple of the chunk size.
            valid = (t0 + t) < seq_len
            h_new = jnp.where(valid, h_new, h)
            c_new = jnp.where(valid, c_new, c)
        return h_new, c_new

    h, c = lax.fori_loop(0, TT, step, (h_ref[...], c_ref[...]), unroll=unroll)
    h_ref[...] = h
    c_ref[...] = c

    # Final FC projection only on the last time chunk; lane-dense (C_p>=128)
    # store so the output write is an unmasked full-lane vst.
    @pl.when(t_idx == n_t - 1)
    def _():
        logits = (
            jnp.dot(h.astype(wfc_ref.dtype), wfc_ref[...],
                    preferred_element_type=jnp.float32)
            + bfc_ref[...]
        )
        out_ref[...] = logits.astype(out_ref.dtype)


def lstm_text_classifier_forward(text, params, *,
                                 matmul_dtype=jnp.float32,
                                 t_chunk=64,
                                 b_blk=None,
                                 vmem_budget_bytes=40 * 1024 * 1024):
    """text: int32 array [B, T].  Returns logits [B, num_class].

    matmul_dtype=jnp.bfloat16 enables bf16 MXU operands on every TPU
    generation (including v5e); gate math stays f32.  Use a looser tolerance
    than 1e-5 when comparing the bf16 path against an f32 reference.
    """
    emb = params["embedding"]        # (V, E)
    w_ih = params["w_ih"]            # (4H, E)  PyTorch layout [i,f,g,o]
    w_hh = params["w_hh"]            # (4H, H)
    b_ih = params["b_ih"]            # (4H,)
    b_hh = params["b_hh"]            # (4H,)
    w_fc = params["w_fc"]            # (C, H)
    b_fc = params["b_fc"]            # (C,)

    B, T = text.shape
    E = emb.shape[1]
    H = w_hh.shape[1]
    C = w_fc.shape[0]

    # ---- padded / tiled sizes -------------------------------------------
    E_p = _round_up(E, 128)
    H_p = _round_up(H, 128)
    C_p = _round_up(C, 128)

    if b_blk is not None:
        B_blk = _round_up(min(b_blk, _round_up(B, 8)), 8)
    elif B <= 256:
        # Single batch block: best for single-TC v5e/v6e (serial recurrence).
        # On v7x pass b_blk explicitly (e.g. round_up(ceil(B/2), 8)) so the
        # "parallel" batch axis gives both TensorCores work.
        B_blk = _round_up(B, 8)
    else:
        B_blk = 256                  # amortize MXU fill/drain on big batches
    B_p = _round_up(B, B_blk)

    # ---- VMEM budget -> time-chunk size TT --------------------------------
    mm_bytes = jnp.dtype(matmul_dtype).itemsize
    fixed_bytes = (
        2 * (E_p + H_p) * 4 * H_p * mm_bytes   # W_x, W_h (double-buffered)
        + 2 * H_p * C_p * mm_bytes             # W_fc
        + 2 * (4 * H_p + C_p) * 4              # biases
        + 2 * B_blk * H_p * 4                  # h, c scratch
        + 2 * B_blk * C_p * 4                  # out block
    )

    def _chunk_bytes(tt):
        return (2 * tt * B_blk * E_p * mm_bytes   # x chunk (double-buffered)
                + tt * B_blk * 4 * H_p * 4)       # xproj scratch (f32)

    tt_cap = max(1, min(t_chunk, T))
    while tt_cap > 1 and fixed_bytes + _chunk_bytes(tt_cap) > vmem_budget_bytes:
        tt_cap -= 1
    # Prefer a divisor of T (no padded timesteps, no per-step mask) unless it
    # would make the chunk much smaller than what fits.
    tt_div = max(d for d in range(1, tt_cap + 1) if T % d == 0)
    TT = tt_div if 2 * tt_div >= tt_cap else tt_cap
    needs_mask = (T % TT != 0)
    T_p = _round_up(T, TT)
    unroll = TT if TT <= 16 else 8

    vmem_est = fixed_bytes + _chunk_bytes(TT)
    vmem_limit = int(min(64 * 1024 * 1024,
                         max(32 * 1024 * 1024, int(1.5 * vmem_est))))

    # ---- glue: embedding gather + layout transforms ----------------------
    # Cast the table first so x lands in HBM (and is DMA'd) at matmul width.
    x = jnp.take(emb.astype(matmul_dtype), text, axis=0)   # (B, T, E)
    x = jnp.transpose(x, (1, 0, 2))                        # (T, B, E)
    x = jnp.pad(x, ((0, T_p - T), (0, B_p - B), (0, E_p - E)))

    # PyTorch gate order [i,f,g,o] -> kernel order [i,f,o,g] so sigmoid gates
    # form one contiguous 3*H_p slab.
    gate_perm = jnp.array([0, 1, 3, 2], dtype=jnp.int32)

    def pack_w(w, in_dim, in_dim_p):
        # (4H, in_dim) -> (in_dim_p, 4*H_p), gate-blocked & zero-padded so
        # padded gate columns produce exactly-zero g-gate pre-activations
        # (=> padded h/c lanes stay 0 through the recurrence).
        w4 = w.reshape(4, H, in_dim)[gate_perm]
        w4 = jnp.pad(w4, ((0, 0), (0, H_p - H), (0, in_dim_p - in_dim)))
        return jnp.transpose(w4.reshape(4 * H_p, in_dim_p))

    w_x = pack_w(w_ih, E, E_p).astype(matmul_dtype)        # (E_p, 4*H_p)
    w_h = pack_w(w_hh, H, H_p).astype(matmul_dtype)        # (H_p, 4*H_p)

    b = (b_ih + b_hh).reshape(4, H)[gate_perm]
    b = jnp.pad(b, ((0, 0), (0, H_p - H))).reshape(1, 4 * H_p)
    b = b.astype(jnp.float32)

    w_fc_p = jnp.pad(w_fc, ((0, C_p - C), (0, H_p - H)))
    w_fc_p = jnp.transpose(w_fc_p).astype(matmul_dtype)    # (H_p, C_p)
    b_fc_p = jnp.pad(b_fc, (0, C_p - C)).reshape(1, C_p).astype(jnp.float32)

    # ---- pallas_call ------------------------------------------------------
    grid = (B_p // B_blk, T_p // TT)
    kernel = functools.partial(_lstm_kernel, seq_len=T,
                               needs_mask=needs_mask, unroll=unroll)

    out_padded = pl.pallas_call(
        kernel,
        out_shape=jax.ShapeDtypeStruct((B_p, C_p), jnp.float32),
        grid_spec=pltpu.PrefetchScalarGridSpec(
            num_scalar_prefetch=0,
            grid=grid,
            in_specs=[
                # streamed time chunks of x (double-buffered by Pallas)
                pl.BlockSpec((TT, B_blk, E_p), lambda b, t: (t, b, 0)),
                # weights/biases: constant block index -> DMA'd once, resident
                pl.BlockSpec((E_p, 4 * H_p), lambda b, t: (0, 0)),
                pl.BlockSpec((H_p, 4 * H_p), lambda b, t: (0, 0)),
                pl.BlockSpec((1, 4 * H_p), lambda b, t: (0, 0)),
                pl.BlockSpec((H_p, C_p), lambda b, t: (0, 0)),
                pl.BlockSpec((1, C_p), lambda b, t: (0, 0)),
            ],
            out_specs=pl.BlockSpec((B_blk, C_p), lambda b, t: (b, 0)),
            scratch_shapes=[
                pltpu.VMEM((B_blk, H_p), jnp.float32),            # h
                pltpu.VMEM((B_blk, H_p), jnp.float32),            # c
                pltpu.VMEM((TT, B_blk, 4 * H_p), jnp.float32),    # x-projection
            ],
        ),
        compiler_params=pltpu.CompilerParams(
            # batch blocks are independent (megacore-parallel on v7x);
            # the time axis is a sequential recurrence.
            dimension_semantics=("parallel", "arbitrary"),
            vmem_limit_bytes=vmem_limit,
        ),
    )(x, w_x, w_h, b, w_fc_p, b_fc_p)

    return out_padded[:B, :C]


def reference_forward(text, params):
    """Pure-JAX reference matching PyTorch nn.LSTM semantics."""
    emb = params["embedding"]
    w_ih, w_hh = params["w_ih"], params["w_hh"]
    b_ih, b_hh = params["b_ih"], params["b_hh"]
    w_fc, b_fc = params["w_fc"], params["b_fc"]
    H = w_hh.shape[1]

    x = jnp.take(emb, text, axis=0)  # (B, T, E)
    B, T, _ = x.shape
    h = jnp.zeros((B, H), jnp.float32)
    c = jnp.zeros((B, H), jnp.float32)
    for t in range(T):
        gates = x[:, t, :] @ w_ih.T + b_ih + h @ w_hh.T + b_hh
        i = jax.nn.sigmoid(gates[:, 0 * H:1 * H])
        f = jax.nn.sigmoid(gates[:, 1 * H:2 * H])
        g = jnp.tanh(gates[:, 2 * H:3 * H])
        o = jax.nn.sigmoid(gates[:, 3 * H:4 * H])
        c = f * c + i * g
        h = o * jnp.tanh(c)
    return h @ w_fc.T + b_fc


def init_params(key, vocab_size, embed_dim, hidden_dim, num_class):
    ks = jax.random.split(key, 7)
    emb = 0.1 * jax.random.normal(ks[0], (vocab_size, embed_dim), jnp.float32)
    emb = emb.at[0].set(0.0)  # padding_idx=0 row zeroed (as in nn.Embedding)
    return {
        "embedding": emb,
        "w_ih": 0.1 * jax.random.normal(ks[1], (4 * hidden_dim, embed_dim), jnp.float32),
        "w_hh": 0.1 * jax.random.normal(ks[2], (4 * hidden_dim, hidden_dim), jnp.float32),
        "b_ih": 0.1 * jax.random.normal(ks[3], (4 * hidden_dim,), jnp.float32),
        "b_hh": 0.1 * jax.random.normal(ks[4], (4 * hidden_dim,), jnp.float32),
        "w_fc": 0.1 * jax.random.normal(ks[5], (num_class, hidden_dim), jnp.float32),
        "b_fc": 0.1 * jax.random.normal(ks[6], (num_class,), jnp.float32),
    }


if __name__ == "__main__":
    vocab_size, embed_dim, hidden_dim, num_class = 50, 16, 32, 4
    batch, seq = 2, 8

    key = jax.random.PRNGKey(0)
    kp, kt = jax.random.split(key)
    params = init_params(kp, vocab_size, embed_dim, hidden_dim, num_class)
    text = jax.random.randint(kt, (batch, seq), 0, vocab_size, dtype=jnp.int32)

    logits = lstm_text_classifier_forward(text, params)
    logits = jax.block_until_ready(logits)

    ref = jax.block_until_ready(reference_forward(text, params))
    assert logits.shape == (batch, num_class)
    assert jnp.allclose(logits, ref, atol=1e-5, rtol=1e-5), (
        f"mismatch: {logits} vs {ref}")

    print("KERNEL_OK")
</pallas_src>

<mosaic_0001>
module attributes {stable_mosaic.version = 11 : i64} {
  func.func @_lstm_kernel(%arg0: i32, %arg1: i32, %arg2: memref<8x8x128xf32, #tpu.memory_space<vmem>>, %arg3: memref<128x512xf32, #tpu.memory_space<vmem>>, %arg4: memref<128x512xf32, #tpu.memory_space<vmem>>, %arg5: memref<1x512xf32, #tpu.memory_space<vmem>>, %arg6: memref<128x128xf32, #tpu.memory_space<vmem>>, %arg7: memref<1x128xf32, #tpu.memory_space<vmem>>, %arg8: memref<8x128xf32, #tpu.memory_space<vmem>>, %arg9: memref<8x128xf32, #tpu.memory_space<vmem>>, %arg10: memref<8x128xf32, #tpu.memory_space<vmem>>, %arg11: memref<8x8x512xf32, #tpu.memory_space<vmem>>) attributes {dimension_semantics = [#tpu.dimension_semantics<parallel>, #tpu.dimension_semantics<arbitrary>], iteration_bounds = array<i64: 1, 1>, scalar_prefetch = 0 : i64, scratch_operands = 3 : i64, tpu.core_type = #tpu.core_type<tc>, window_params = [{transform_indices = @transform_0, window_bounds = array<i64: 8, 8, 128>}, {pipeline_mode = #tpu.pipeline_mode<synchronous>, transform_indices = @transform_1, window_bounds = array<i64: 128, 512>}, {pipeline_mode = #tpu.pipeline_mode<synchronous>, transform_indices = @transform_2, window_bounds = array<i64: 128, 512>}, {pipeline_mode = #tpu.pipeline_mode<synchronous>, transform_indices = @transform_3, window_bounds = array<i64: 1, 512>}, {pipeline_mode = #tpu.pipeline_mode<synchronous>, transform_indices = @transform_4, window_bounds = array<i64: 128, 128>}, {pipeline_mode = #tpu.pipeline_mode<synchronous>, transform_indices = @transform_5, window_bounds = array<i64: 1, 128>}, {transform_indices = @transform_6, window_bounds = array<i64: 8, 128>}]} {
    %c0_i32 = arith.constant 0 : i32
    %0 = arith.cmpi eq, %arg1, %c0_i32 : i32
    %1 = arith.extui %0 : i1 to i32
    %c0_i32_0 = arith.constant 0 : i32
    %2 = arith.cmpi ne, %1, %c0_i32_0 : i32
    scf.if %2 {
      %cst_71 = arith.constant 0.000000e+00 : f32
      %204 = vector.broadcast %cst_71 : f32 to vector<8x128xf32>
      %c0_72 = arith.constant 0 : index
      %c0_73 = arith.constant 0 : index
      %205 = vector.load %arg9[%c0_72, %c0_73] : memref<8x128xf32, #tpu.memory_space<vmem>>, vector<8x128xf32>
      tpu.vector_store %arg9[%c0_72, %c0_73], %204 {strides = array<i32>} : memref<8x128xf32, #tpu.memory_space<vmem>>, vector<8x128xf32>,
      %cst_74 = arith.constant 0.000000e+00 : f32
      %206 = vector.broadcast %cst_74 : f32 to vector<8x128xf32>
      %c0_75 = arith.constant 0 : index
      %c0_76 = arith.constant 0 : index
      %207 = vector.load %arg10[%c0_75, %c0_76] : memref<8x128xf32, #tpu.memory_space<vmem>>, vector<8x128xf32>
      tpu.vector_store %arg10[%c0_75, %c0_76], %206 {strides = array<i32>} : memref<8x128xf32, #tpu.memory_space<vmem>>, vector<8x128xf32>,
    } else {
    }
    %c0 = arith.constant 0 : index
    %c0_1 = arith.constant 0 : index
    %c0_2 = arith.constant 0 : index
    %3 = vector.load %arg2[%c0, %c0_1, %c0_2] : memref<8x8x128xf32, #tpu.memory_space<vmem>>, vector<8x8x128xf32>
    %4 = vector.shape_cast %3 : vector<8x8x128xf32> to vector<64x128xf32>
    %c0_3 = arith.constant 0 : index
    %c0_4 = arith.constant 0 : index
    %5 = vector.load %arg3[%c0_3, %c0_4] : memref<128x512xf32, #tpu.memory_space<vmem>>, vector<128x512xf32>
    %cst = arith.constant dense<0.000000e+00> : vector<64x512xf32>
    %6 = tpu.matmul %4, %5, %cst {dimension_numbers = #tpu.dot_dimension_numbers<[1], [0], [0], [1], [0, 0, 1, 1], [], []>} : vector<64x128xf32>, vector<128x512xf32>, vector<64x512xf32> -> vector<64x512xf32>
    %c0_5 = arith.constant 0 : index
    %c0_6 = arith.constant 0 : index
    %7 = vector.load %arg5[%c0_5, %c0_6] : memref<1x512xf32, #tpu.memory_space<vmem>>, vector<1x512xf32>
    %8 = vector.broadcast %7 : vector<1x512xf32> to vector<64x512xf32>
    %9 = arith.addf %6, %8 : vector<64x512xf32>
    %10 = vector.shape_cast %9 : vector<64x512xf32> to vector<8x8x512xf32>
    %c0_7 = arith.constant 0 : index
    %c0_8 = arith.constant 0 : index
    %c0_9 = arith.constant 0 : index
    %11 = vector.load %arg11[%c0_7, %c0_8, %c0_9] : memref<8x8x512xf32, #tpu.memory_space<vmem>>, vector<8x8x512xf32>
    tpu.vector_store %arg11[%c0_7, %c0_8, %c0_9], %10 {strides = array<i32>} : memref<8x8x512xf32, #tpu.memory_space<vmem>>, vector<8x8x512xf32>,
    %c0_10 = arith.constant 0 : index
    %c0_11 = arith.constant 0 : index
    %12 = vector.load %arg4[%c0_10, %c0_11] : memref<128x512xf32, #tpu.memory_space<vmem>>, vector<128x512xf32>
    %c0_12 = arith.constant 0 : index
    %c0_13 = arith.constant 0 : index
    %13 = vector.load %arg9[%c0_12, %c0_13] : memref<8x128xf32, #tpu.memory_space<vmem>>, vector<8x128xf32>
    %c0_14 = arith.constant 0 : index
    %c0_15 = arith.constant 0 : index
    %14 = vector.load %arg10[%c0_14, %c0_15] : memref<8x128xf32, #tpu.memory_space<vmem>>, vector<8x128xf32>
    %c0_i32_16 = arith.constant 0 : i32
    %15 = arith.index_cast %c0_i32_16 : i32 to index
    %c0_17 = arith.constant 0 : index
    %c0_18 = arith.constant 0 : index
    %16 = vector.load %arg11[%15, %c0_17, %c0_18] : memref<8x8x512xf32, #tpu.memory_space<vmem>>, vector<1x8x512xf32>
    %17 = vector.shape_cast %16 : vector<1x8x512xf32> to vector<8x512xf32>
    %cst_19 = arith.constant dense<0.000000e+00> : vector<8x512xf32>
    %18 = tpu.matmul %13, %12, %cst_19 {dimension_numbers = #tpu.dot_dimension_numbers<[1], [0], [0], [1], [0, 0, 1, 1], [], []>} : vector<8x128xf32>, vector<128x512xf32>, vector<8x512xf32> -> vector<8x512xf32>
    %19 = arith.addf %17, %18 : vector<8x512xf32>
    %20 = vector.extract_strided_slice %19 {offsets = [0, 0], sizes = [8, 384], strides = [1, 1]} : vector<8x512xf32> to vector<8x384xf32>
    %cst_20 = arith.constant 5.000000e-01 : f32
    %21 = vector.broadcast %cst_20 : f32 to vector<8x384xf32>
    %22 = arith.mulf %21, %20 : vector<8x384xf32>
    %23 = math.tanh %22 : vector<8x384xf32>
    %cst_21 = arith.constant 1.000000e+00 : f32
    %24 = vector.broadcast %cst_21 : f32 to vector<8x384xf32>
    %25 = arith.addf %23, %24 : vector<8x384xf32>
    %cst_22 = arith.constant 5.000000e-01 : f32
    %26 = vector.broadcast %cst_22 : f32 to vector<8x384xf32>
    %27 = arith.mulf %26, %25 : vector<8x384xf32>
    %28 = vector.extract_strided_slice %27 {offsets = [0, 0], sizes = [8, 128], strides = [1, 1]} : vector<8x384xf32> to vector<8x128xf32>
    %29 = vector.extract_strided_slice %27 {offsets = [0, 128], sizes = [8, 128], strides = [1, 1]} : vector<8x384xf32> to vector<8x128xf32>
    %30 = vector.extract_strided_slice %27 {offsets = [0, 256], sizes = [8, 128], strides = [1, 1]} : vector<8x384xf32> to vector<8x128xf32>
    %31 = vector.extract_strided_slice %19 {offsets = [0, 384], sizes = [8, 128], strides = [1, 1]} : vector<8x512xf32> to vector<8x128xf32>
    %32 = math.tanh %31 : vector<8x128xf32>
    %33 = arith.mulf %29, %14 : vector<8x128xf32>
    %34 = arith.mulf %28, %32 : vector<8x128xf32>
    %35 = arith.addf %33, %34 : vector<8x128xf32>
    %36 = math.tanh %35 : vector<8x128xf32>
    %37 = arith.mulf %30, %36 : vector<8x128xf32>
    %c1_i32 = arith.constant 1 : i32
    %38 = arith.index_cast %c1_i32 : i32 to index
    %c0_23 = arith.constant 0 : index
    %c0_24 = arith.constant 0 : index
    %39 = vector.load %arg11[%38, %c0_23, %c0_24] : memref<8x8x512xf32, #tpu.memory_space<vmem>>, vector<1x8x512xf32>
    %40 = vector.shape_cast %39 : vector<1x8x512xf32> to vector<8x512xf32>
    %cst_25 = arith.constant dense<0.000000e+00> : vector<8x512xf32>
    %41 = tpu.matmul %37, %12, %cst_25 {dimension_numbers = #tpu.dot_dimension_numbers<[1], [0], [0], [1], [0, 0, 1, 1], [], []>} : vector<8x128xf32>, vector<128x512xf32>, vector<8x512xf32> -> vector<8x512xf32>
    %42 = arith.addf %40, %41 : vector<8x512xf32>
    %43 = vector.extract_strided_slice %42 {offsets = [0, 0], sizes = [8, 384], strides = [1, 1]} : vector<8x512xf32> to vector<8x384xf32>
    %cst_26 = arith.constant 5.000000e-01 : f32
    %44 = vector.broadcast %cst_26 : f32 to vector<8x384xf32>
    %45 = arith.mulf %44, %43 : vector<8x384xf32>
    %46 = math.tanh %45 : vector<8x384xf32>
    %cst_27 = arith.constant 1.000000e+00 : f32
    %47 = vector.broadcast %cst_27 : f32 to vector<8x384xf32>
    %48 = arith.addf %46, %47 : vector<8x384xf32>
    %cst_28 = arith.constant 5.000000e-01 : f32
    %49 = vector.broadcast %cst_28 : f32 to vector<8x384xf32>
    %50 = arith.mulf %49, %48 : vector<8x384xf32>
    %51 = vector.extract_strided_slice %50 {offsets = [0, 0], sizes = [8, 128], strides = [1, 1]} : vector<8x384xf32> to vector<8x128xf32>
    %52 = vector.extract_strided_slice %50 {offsets = [0, 128], sizes = [8, 128], strides = [1, 1]} : vector<8x384xf32> to vector<8x128xf32>
    %53 = vector.extract_strided_slice %50 {offsets = [0, 256], sizes = [8, 128], strides = [1, 1]} : vector<8x384xf32> to vector<8x128xf32>
    %54 = vector.extract_strided_slice %42 {offsets = [0, 384], sizes = [8, 128], strides = [1, 1]} : vector<8x512xf32> to vector<8x128xf32>
    %55 = math.tanh %54 : vector<8x128xf32>
    %56 = arith.mulf %52, %35 : vector<8x128xf32>
    %57 = arith.mulf %51, %55 : vector<8x128xf32>
    %58 = arith.addf %56, %57 : vector<8x128xf32>
    %59 = math.tanh %58 : vector<8x128xf32>
    %60 = arith.mulf %53, %59 : vector<8x128xf32>
    %c2_i32 = arith.constant 2 : i32
    %61 = arith.index_cast %c2_i32 : i32 to index
    %c0_29 = arith.constant 0 : index
    %c0_30 = arith.constant 0 : index
    %62 = vector.load %arg11[%61, %c0_29, %c0_30] : memref<8x8x512xf32, #tpu.memory_space<vmem>>, vector<1x8x512xf32>
    %63 = vector.shape_cast %62 : vector<1x8x512xf32> to vector<8x512xf32>
    %cst_31 = arith.constant dense<0.000000e+00> : vector<8x512xf32>
    %64 = tpu.matmul %60, %12, %cst_31 {dimension_numbers = #tpu.dot_dimension_numbers<[1], [0], [0], [1], [0, 0, 1, 1], [], []>} : vector<8x128xf32>, vector<128x512xf32>, vector<8x512xf32> -> vector<8x512xf32>
    %65 = arith.addf %63, %64 : vector<8x512xf32>
    %66 = vector.extract_strided_slice %65 {offsets = [0, 0], sizes = [8, 384], strides = [1, 1]} : vector<8x512xf32> to vector<8x384xf32>
    %cst_32 = arith.constant 5.000000e-01 : f32
    %67 = vector.broadcast %cst_32 : f32 to vector<8x384xf32>
    %68 = arith.mulf %67, %66 : vector<8x384xf32>
    %69 = math.tanh %68 : vector<8x384xf32>
    %cst_33 = arith.constant 1.000000e+00 : f32
    %70 = vector.broadcast %cst_33 : f32 to vector<8x384xf32>
    %71 = arith.addf %69, %70 : vector<8x384xf32>
    %cst_34 = arith.constant 5.000000e-01 : f32
    %72 = vector.broadcast %cst_34 : f32 to vector<8x384xf32>
    %73 = arith.mulf %72, %71 : vector<8x384xf32>
    %74 = vector.extract_strided_slice %73 {offsets = [0, 0], sizes = [8, 128], strides = [1, 1]} : vector<8x384xf32> to vector<8x128xf32>
    %75 = vector.extract_strided_slice %73 {offsets = [0, 128], sizes = [8, 128], strides = [1, 1]} : vector<8x384xf32> to vector<8x128xf32>
    %76 = vector.extract_strided_slice %73 {offsets = [0, 256], sizes = [8, 128], strides = [1, 1]} : vector<8x384xf32> to vector<8x128xf32>
    %77 = vector.extract_strided_slice %65 {offsets = [0, 384], sizes = [8, 128], strides = [1, 1]} : vector<8x512xf32> to vector<8x128xf32>
    %78 = math.tanh %77 : vector<8x128xf32>
    %79 = arith.mulf %75, %58 : vector<8x128xf32>
    %80 = arith.mulf %74, %78 : vector<8x128xf32>
    %81 = arith.addf %79, %80 : vector<8x128xf32>
    %82 = math.tanh %81 : vector<8x128xf32>
    %83 = arith.mulf %76, %82 : vector<8x128xf32>
    %c3_i32 = arith.constant 3 : i32
    %84 = arith.index_cast %c3_i32 : i32 to index
    %c0_35 = arith.constant 0 : index
    %c0_36 = arith.constant 0 : index
    %85 = vector.load %arg11[%84, %c0_35, %c0_36] : memref<8x8x512xf32, #tpu.memory_space<vmem>>, vector<1x8x512xf32>
    %86 = vector.shape_cast %85 : vector<1x8x512xf32> to vector<8x512xf32>
    %cst_37 = arith.constant dense<0.000000e+00> : vector<8x512xf32>
    %87 = tpu.matmul %83, %12, %cst_37 {dimension_numbers = #tpu.dot_dimension_numbers<[1], [0], [0], [1], [0, 0, 1, 1], [], []>} : vector<8x128xf32>, vector<128x512xf32>, vector<8x512xf32> -> vector<8x512xf32>
    %88 = arith.addf %86, %87 : vector<8x512xf32>
    %89 = vector.extract_strided_slice %88 {offsets = [0, 0], sizes = [8, 384], strides = [1, 1]} : vector<8x512xf32> to vector<8x384xf32>
    %cst_38 = arith.constant 5.000000e-01 : f32
    %90 = vector.broadcast %cst_38 : f32 to vector<8x384xf32>
    %91 = arith.mulf %90, %89 : vector<8x384xf32>
    %92 = math.tanh %91 : vector<8x384xf32>
    %cst_39 = arith.constant 1.000000e+00 : f32
    %93 = vector.broadcast %cst_39 : f32 to vector<8x384xf32>
    %94 = arith.addf %92, %93 : vector<8x384xf32>
    %cst_40 = arith.constant 5.000000e-01 : f32
    %95 = vector.broadcast %cst_40 : f32 to vector<8x384xf32>
    %96 = arith.mulf %95, %94 : vector<8x384xf32>
    %97 = vector.extract_strided_slice %96 {offsets = [0, 0], sizes = [8, 128], strides = [1, 1]} : vector<8x384xf32> to vector<8x128xf32>
    %98 = vector.extract_strided_slice %96 {offsets = [0, 128], sizes = [8, 128], strides = [1, 1]} : vector<8x384xf32> to vector<8x128xf32>
    %99 = vector.extract_strided_slice %96 {offsets = [0, 256], sizes = [8, 128], strides = [1, 1]} : vector<8x384xf32> to vector<8x128xf32>
    %100 = vector.extract_strided_slice %88 {offsets = [0, 384], sizes = [8, 128], strides = [1, 1]} : vector<8x512xf32> to vector<8x128xf32>
    %101 = math.tanh %100 : vector<8x128xf32>
    %102 = arith.mulf %98, %81 : vector<8x128xf32>
    %103 = arith.mulf %97, %101 : vector<8x128xf32>
    %104 = arith.addf %102, %103 : vector<8x128xf32>
    %105 = math.tanh %104 : vector<8x128xf32>
    %106 = arith.mulf %99, %105 : vector<8x128xf32>
    %c4_i32 = arith.constant 4 : i32
    %107 = arith.index_cast %c4_i32 : i32 to index
    %c0_41 = arith.constant 0 : index
    %c0_42 = arith.constant 0 : index
    %108 = vector.load %arg11[%107, %c0_41, %c0_42] : memref<8x8x512xf32, #tpu.memory_space<vmem>>, vector<1x8x512xf32>
    %109 = vector.shape_cast %108 : vector<1x8x512xf32> to vector<8x512xf32>
    %cst_43 = arith.constant dense<0.000000e+00> : vector<8x512xf32>
    %110 = tpu.matmul %106, %12, %cst_43 {dimension_numbers = #tpu.dot_dimension_numbers<[1], [0], [0], [1], [0, 0, 1, 1], [], []>} : vector<8x128xf32>, vector<128x512xf32>, vector<8x512xf32> -> vector<8x512xf32>
    %111 = arith.addf %109, %110 : vector<8x512xf32>
    %112 = vector.extract_strided_slice %111 {offsets = [0, 0], sizes = [8, 384], strides = [1, 1]} : vector<8x512xf32> to vector<8x384xf32>
    %cst_44 = arith.constant 5.000000e-01 : f32
    %113 = vector.broadcast %cst_44 : f32 to vector<8x384xf32>
    %114 = arith.mulf %113, %112 : vector<8x384xf32>
    %115 = math.tanh %114 : vector<8x384xf32>
    %cst_45 = arith.constant 1.000000e+00 : f32
    %116 = vector.broadcast %cst_45 : f32 to vector<8x384xf32>
    %117 = arith.addf %115, %116 : vector<8x384xf32>
    %cst_46 = arith.constant 5.000000e-01 : f32
    %118 = vector.broadcast %cst_46 : f32 to vector<8x384xf32>
    %119 = arith.mulf %118, %117 : vector<8x384xf32>
    %120 = vector.extract_strided_slice %119 {offsets = [0, 0], sizes = [8, 128], strides = [1, 1]} : vector<8x384xf32> to vector<8x128xf32>
    %121 = vector.extract_strided_slice %119 {offsets = [0, 128], sizes = [8, 128], strides = [1, 1]} : vector<8x384xf32> to vector<8x128xf32>
    %122 = vector.extract_strided_slice %119 {offsets = [0, 256], sizes = [8, 128], strides = [1, 1]} : vector<8x384xf32> to vector<8x128xf32>
    %123 = vector.extract_strided_slice %111 {offsets = [0, 384], sizes = [8, 128], strides = [1, 1]} : vector<8x512xf32> to vector<8x128xf32>
    %124 = math.tanh %123 : vector<8x128xf32>
    %125 = arith.mulf %121, %104 : vector<8x128xf32>
    %126 = arith.mulf %120, %124 : vector<8x128xf32>
    %127 = arith.addf %125, %126 : vector<8x128xf32>
    %128 = math.tanh %127 : vector<8x128xf32>
    %129 = arith.mulf %122, %128 : vector<8x128xf32>
    %c5_i32 = arith.constant 5 : i32
    %130 = arith.index_cast %c5_i32 : i32 to index
    %c0_47 = arith.constant 0 : index
    %c0_48 = arith.constant 0 : index
    %131 = vector.load %arg11[%130, %c0_47, %c0_48] : memref<8x8x512xf32, #tpu.memory_space<vmem>>, vector<1x8x512xf32>
    %132 = vector.shape_cast %131 : vector<1x8x512xf32> to vector<8x512xf32>
    %cst_49 = arith.constant dense<0.000000e+00> : vector<8x512xf32>
    %133 = tpu.matmul %129, %12, %cst_49 {dimension_numbers = #tpu.dot_dimension_numbers<[1], [0], [0], [1], [0, 0, 1, 1], [], []>} : vector<8x128xf32>, vector<128x512xf32>, vector<8x512xf32> -> vector<8x512xf32>
    %134 = arith.addf %132, %133 : vector<8x512xf32>
    %135 = vector.extract_strided_slice %134 {offsets = [0, 0], sizes = [8, 384], strides = [1, 1]} : vector<8x512xf32> to vector<8x384xf32>
    %cst_50 = arith.constant 5.000000e-01 : f32
    %136 = vector.broadcast %cst_50 : f32 to vector<8x384xf32>
    %137 = arith.mulf %136, %135 : vector<8x384xf32>
    %138 = math.tanh %137 : vector<8x384xf32>
    %cst_51 = arith.constant 1.000000e+00 : f32
    %139 = vector.broadcast %cst_51 : f32 to vector<8x384xf32>
    %140 = arith.addf %138, %139 : vector<8x384xf32>
    %cst_52 = arith.constant 5.000000e-01 : f32
    %141 = vector.broadcast %cst_52 : f32 to vector<8x384xf32>
    %142 = arith.mulf %141, %140 : vector<8x384xf32>
    %143 = vector.extract_strided_slice %142 {offsets = [0, 0], sizes = [8, 128], strides = [1, 1]} : vector<8x384xf32> to vector<8x128xf32>
    %144 = vector.extract_strided_slice %142 {offsets = [0, 128], sizes = [8, 128], strides = [1, 1]} : vector<8x384xf32> to vector<8x128xf32>
    %145 = vector.extract_strided_slice %142 {offsets = [0, 256], sizes = [8, 128], strides = [1, 1]} : vector<8x384xf32> to vector<8x128xf32>
    %146 = vector.extract_strided_slice %134 {offsets = [0, 384], sizes = [8, 128], strides = [1, 1]} : vector<8x512xf32> to vector<8x128xf32>
    %147 = math.tanh %146 : vector<8x128xf32>
    %148 = arith.mulf %144, %127 : vector<8x128xf32>
    %149 = arith.mulf %143, %147 : vector<8x128xf32>
    %150 = arith.addf %148, %149 : vector<8x128xf32>
    %151 = math.tanh %150 : vector<8x128xf32>
    %152 = arith.mulf %145, %151 : vector<8x128xf32>
    %c6_i32 = arith.constant 6 : i32
    %153 = arith.index_cast %c6_i32 : i32 to index
    %c0_53 = arith.constant 0 : index
    %c0_54 = arith.constant 0 : index
    %154 = vector.load %arg11[%153, %c0_53, %c0_54] : memref<8x8x512xf32, #tpu.memory_space<vmem>>, vector<1x8x512xf32>
    %155 = vector.shape_cast %154 : vector<1x8x512xf32> to vector<8x512xf32>
    %cst_55 = arith.constant dense<0.000000e+00> : vector<8x512xf32>
    %156 = tpu.matmul %152, %12, %cst_55 {dimension_numbers = #tpu.dot_dimension_numbers<[1], [0], [0], [1], [0, 0, 1, 1], [], []>} : vector<8x128xf32>, vector<128x512xf32>, vector<8x512xf32> -> vector<8x512xf32>
    %157 = arith.addf %155, %156 : vector<8x512xf32>
    %158 = vector.extract_strided_slice %157 {offsets = [0, 0], sizes = [8, 384], strides = [1, 1]} : vector<8x512xf32> to vector<8x384xf32>
    %cst_56 = arith.constant 5.000000e-01 : f32
    %159 = vector.broadcast %cst_56 : f32 to vector<8x384xf32>
    %160 = arith.mulf %159, %158 : vector<8x384xf32>
    %161 = math.tanh %160 : vector<8x384xf32>
    %cst_57 = arith.constant 1.000000e+00 : f32
    %162 = vector.broadcast %cst_57 : f32 to vector<8x384xf32>
    %163 = arith.addf %161, %162 : vector<8x384xf32>
    %cst_58 = arith.constant 5.000000e-01 : f32
    %164 = vector.broadcast %cst_58 : f32 to vector<8x384xf32>
    %165 = arith.mulf %164, %163 : vector<8x384xf32>
    %166 = vector.extract_strided_slice %165 {offsets = [0, 0], sizes = [8, 128], strides = [1, 1]} : vector<8x384xf32> to vector<8x128xf32>
    %167 = vector.extract_strided_slice %165 {offsets = [0, 128], sizes = [8, 128], strides = [1, 1]} : vector<8x384xf32> to vector<8x128xf32>
    %168 = vector.extract_strided_slice %165 {offsets = [0, 256], sizes = [8, 128], strides = [1, 1]} : vector<8x384xf32> to vector<8x128xf32>
    %169 = vector.extract_strided_slice %157 {offsets = [0, 384], sizes = [8, 128], strides = [1, 1]} : vector<8x512xf32> to vector<8x128xf32>
    %170 = math.tanh %169 : vector<8x128xf32>
    %171 = arith.mulf %167, %150 : vector<8x128xf32>
    %172 = arith.mulf %166, %170 : vector<8x128xf32>
    %173 = arith.addf %171, %172 : vector<8x128xf32>
    %174 = math.tanh %173 : vector<8x128xf32>
    %175 = arith.mulf %168, %174 : vector<8x128xf32>
    %c7_i32 = arith.constant 7 : i32
    %176 = arith.index_cast %c7_i32 : i32 to index
    %c0_59 = arith.constant 0 : index
    %c0_60 = arith.constant 0 : index
    %177 = vector.load %arg11[%176, %c0_59, %c0_60] : memref<8x8x512xf32, #tpu.memory_space<vmem>>, vector<1x8x512xf32>
    %178 = vector.shape_cast %177 : vector<1x8x512xf32> to vector<8x512xf32>
    %cst_61 = arith.constant dense<0.000000e+00> : vector<8x512xf32>
    %179 = tpu.matmul %175, %12, %cst_61 {dimension_numbers = #tpu.dot_dimension_numbers<[1], [0], [0], [1], [0, 0, 1, 1], [], []>} : vector<8x128xf32>, vector<128x512xf32>, vector<8x512xf32> -> vector<8x512xf32>
    %180 = arith.addf %178, %179 : vector<8x512xf32>
    %181 = vector.extract_strided_slice %180 {offsets = [0, 0], sizes = [8, 384], strides = [1, 1]} : vector<8x512xf32> to vector<8x384xf32>
    %cst_62 = arith.constant 5.000000e-01 : f32
    %182 = vector.broadcast %cst_62 : f32 to vector<8x384xf32>
    %183 = arith.mulf %182, %181 : vector<8x384xf32>
    %184 = math.tanh %183 : vector<8x384xf32>
    %cst_63 = arith.constant 1.000000e+00 : f32
    %185 = vector.broadcast %cst_63 : f32 to vector<8x384xf32>
    %186 = arith.addf %184, %185 : vector<8x384xf32>
    %cst_64 = arith.constant 5.000000e-01 : f32
    %187 = vector.broadcast %cst_64 : f32 to vector<8x384xf32>
    %188 = arith.mulf %187, %186 : vector<8x384xf32>
    %189 = vector.extract_strided_slice %188 {offsets = [0, 0], sizes = [8, 128], strides = [1, 1]} : vector<8x384xf32> to vector<8x128xf32>
    %190 = vector.extract_strided_slice %188 {offsets = [0, 128], sizes = [8, 128], strides = [1, 1]} : vector<8x384xf32> to vector<8x128xf32>
    %191 = vector.extract_strided_slice %188 {offsets = [0, 256], sizes = [8, 128], strides = [1, 1]} : vector<8x384xf32> to vector<8x128xf32>
    %192 = vector.extract_strided_slice %180 {offsets = [0, 384], sizes = [8, 128], strides = [1, 1]} : vector<8x512xf32> to vector<8x128xf32>
    %193 = math.tanh %192 : vector<8x128xf32>
    %194 = arith.mulf %190, %173 : vector<8x128xf32>
    %195 = arith.mulf %189, %193 : vector<8x128xf32>
    %196 = arith.addf %194, %195 : vector<8x128xf32>
    %197 = math.tanh %196 : vector<8x128xf32>
    %198 = arith.mulf %191, %197 : vector<8x128xf32>
    %c8_i32 = arith.constant 8 : i32
    %c0_65 = arith.constant 0 : index
    %c0_66 = arith.constant 0 : index
    %199 = vector.load %arg9[%c0_65, %c0_66] : memref<8x128xf32, #tpu.memory_space<vmem>>, vector<8x128xf32>
    tpu.vector_store %arg9[%c0_65, %c0_66], %198 {strides = array<i32>} : memref<8x128xf32, #tpu.memory_space<vmem>>, vector<8x128xf32>,
    %c0_67 = arith.constant 0 : index
    %c0_68 = arith.constant 0 : index
    %200 = vector.load %arg10[%c0_67, %c0_68] : memref<8x128xf32, #tpu.memory_space<vmem>>, vector<8x128xf32>
    tpu.vector_store %arg10[%c0_67, %c0_68], %196 {strides = array<i32>} : memref<8x128xf32, #tpu.memory_space<vmem>>, vector<8x128xf32>,
    %c0_i32_69 = arith.constant 0 : i32
    %201 = arith.cmpi eq, %arg1, %c0_i32_69 : i32
    %202 = arith.extui %201 : i1 to i32
    %c0_i32_70 = arith.constant 0 : i32
    %203 = arith.cmpi ne, %202, %c0_i32_70 : i32
    scf.if %203 {
      %c0_71 = arith.constant 0 : index
      %c0_72 = arith.constant 0 : index
      %204 = vector.load %arg6[%c0_71, %c0_72] : memref<128x128xf32, #tpu.memory_space<vmem>>, vector<128x128xf32>
      %cst_73 = arith.constant dense<0.000000e+00> : vector<8x128xf32>
      %205 = tpu.matmul %198, %204, %cst_73 {dimension_numbers = #tpu.dot_dimension_numbers<[1], [0], [0], [1], [0, 0, 1, 1], [], []>} : vector<8x128xf32>, vector<128x128xf32>, vector<8x128xf32> -> vector<8x128xf32>
      %c0_74 = arith.constant 0 : index
      %c0_75 = arith.constant 0 : index
      %206 = vector.load %arg7[%c0_74, %c0_75] : memref<1x128xf32, #tpu.memory_space<vmem>>, vector<1x128xf32>
      %207 = vector.broadcast %206 : vector<1x128xf32> to vector<8x128xf32>
      %208 = arith.addf %205, %207 : vector<8x128xf32>
      %c0_76 = arith.constant 0 : index
      %c0_77 = arith.constant 0 : index
      %209 = vector.load %arg8[%c0_76, %c0_77] : memref<8x128xf32, #tpu.memory_space<vmem>>, vector<8x128xf32>
      tpu.vector_store %arg8[%c0_76, %c0_77], %208 {strides = array<i32>} : memref<8x128xf32, #tpu.memory_space<vmem>>, vector<8x128xf32>,
    } else {
    }
    return
  }
  func.func @transform_0(%arg0: i32, %arg1: i32) -> (i32, i32, i32) {
    %c0_i32 = arith.constant 0 : i32
    %c0_i32_0 = arith.constant 0 : i32
    return %arg1, %arg0, %c0_i32 : i32, i32, i32
  }
  func.func @transform_1(%arg0: i32, %arg1: i32) -> (i32, i32) {
    %c0_i32 = arith.constant 0 : i32
    %c0_i32_0 = arith.constant 0 : i32
    %c0_i32_1 = arith.constant 0 : i32
    return %c0_i32, %c0_i32_0 : i32, i32
  }
  func.func @transform_2(%arg0: i32, %arg1: i32) -> (i32, i32) {
    %c0_i32 = arith.constant 0 : i32
    %c0_i32_0 = arith.constant 0 : i32
    %c0_i32_1 = arith.constant 0 : i32
    return %c0_i32, %c0_i32_0 : i32, i32
  }
  func.func @transform_3(%arg0: i32, %arg1: i32) -> (i32, i32) {
    %c0_i32 = arith.constant 0 : i32
    %c0_i32_0 = arith.constant 0 : i32
    %c0_i32_1 = arith.constant 0 : i32
    return %c0_i32, %c0_i32_0 : i32, i32
  }
  func.func @transform_4(%arg0: i32, %arg1: i32) -> (i32, i32) {
    %c0_i32 = arith.constant 0 : i32
    %c0_i32_0 = arith.constant 0 : i32
    %c0_i32_1 = arith.constant 0 : i32
    return %c0_i32, %c0_i32_0 : i32, i32
  }
  func.func @transform_5(%arg0: i32, %arg1: i32) -> (i32, i32) {
    %c0_i32 = arith.constant 0 : i32
    %c0_i32_0 = arith.constant 0 : i32
    %c0_i32_1 = arith.constant 0 : i32
    return %c0_i32, %c0_i32_0 : i32, i32
  }
  func.func @transform_6(%arg0: i32, %arg1: i32) -> (i32, i32) {
    %c0_i32 = arith.constant 0 : i32
    %c0_i32_0 = arith.constant 0 : i32
    return %arg0, %c0_i32 : i32, i32
  }
}

</mosaic_0001>

<bundles_post_ra>
// kernel: tpu_custom_call.1
= control target key start
LH: loop header
LB: loop body
LE: loop exit
PB: predicated region body
PF: predicated region fallthrough
CT: control target
= control target key end

     0   :  { %11 = vsyncpa [#allocation6], 0  ;;  %s3452_s0 = inlined_call_operand.hbm [shape: f32[8,8,128], index: 0, kind: input, shape index: {}]   ;;  %s3453_s1 = inlined_call_operand.hbm [shape: f32[128,512], index: 1, kind: input, shape index: {}]   ;;  %s3454_s2 = inlined_call_operand.hbm [shape: f32[128,512], index: 2, kind: input, shape index: {}]   ;;  %s3455_s3 = inlined_call_operand.vmem [shape: f32[1,512], index: 3, kind: input, shape index: {}]   ;;  %s3456_s4 = inlined_call_operand.hbm [shape: f32[128,128], index: 4, kind: input, shape index: {}]   ;;  %s3457_s5 = inlined_call_operand.vmem [shape: f32[1,128], index: 5, kind: input, shape index: {}]   ;;  %s3458_s6 = inlined_call_operand.hbm [shape: f32[8,128], index: 6, kind: output, shape index: {}]  }
   0x1   :  { %12 = vsyncpa [#allocation9], 0 }
   0x2   :  { %13 = vsyncpa [#allocation12], 0 }
   0x3   :  { %14 = vsyncpa [#allocation7], 0  ;;  %s2897_s21 = smov [#allocation8]   ;;  %s2779_s25 = scalar_lea.hbm %s3453_s1, 8192 }
   0x4   :  { %s32_s22 = sshll.u32 %s2897_s21, 4  ;;  %p2780_p0 = scmp.ne.s32.totalorder %s3453_s1, %s2779_s25  ;;  %s33_s22 = int_to_ptr.vmem [resolvable:$true] %s32_s22 }
   0x5   :  { %p2783_p1 = scmp.lt.u32.totalorder %s2779_s25, %s3453_s1 }
   0x7   :  { %p2785_p2 = pnand %p2783_p1, %p2780_p0 }
   0x9   :  { %2788 = shalt.err (!%p2785_p2)
}
   0xa   :  { %s2789_s30 = scalar_lea.vmem %s33_s22, 8192  ;;  %p2794_p4 = scmp.lt.s32.totalorder %s33_s22, %s33_s22 }
   0xb   :  { %p2790_p3 = scmp.ne.s32.totalorder %s33_s22, %s2789_s30  ;;  %p2795_p5 = scmp.lt.s32.totalorder %s2789_s30, %s2789_s30 }
   0xd   :  { %p2796_p6 = por %p2795_p5, %p2794_p4 }
   0xf   :  { %p2797_p7 = pnand %p2796_p6, %p2790_p3 }
  0x11   :  { %2800 = shalt.err (!%p2797_p7)
}
  0x12   :  { %s2898_s7 = smov 512   ;;  %s2899_s8 = smov 32  }
  0x13   :  { %38 = dma.hbm_to_vmem [thread:$0]  %s3453_s1, 8192, %s33_s22, [#allocation9], %s2898_s7, %s2898_s7, %s2899_s8  }
  0x14   :  { %s2900_s11 = smov [#allocation5]   ;;  %s2801_s15 = scalar_lea.hbm %s3452_s0, 1024 }
  0x15   :  { %s20_s12 = sshll.u32 %s2900_s11, 4  ;;  %p2802_p8 = scmp.ne.s32.totalorder %s3452_s0, %s2801_s15  ;;  %s21_s12 = int_to_ptr.vmem [resolvable:$true] %s20_s12 }
  0x16   :  { %p2805_p9 = scmp.lt.u32.totalorder %s2801_s15, %s3452_s0 }
  0x18   :  { %p2807_p10 = pnand %p2805_p9, %p2802_p8 }
  0x1a   :  { %2810 = shalt.err (!%p2807_p10)
}
  0x1b   :  { %s2811_s20 = scalar_lea.vmem %s21_s12, 1024  ;;  %p2816_p12 = scmp.lt.s32.totalorder %s21_s12, %s21_s12 }
  0x1c   :  { %p2812_p11 = scmp.ne.s32.totalorder %s21_s12, %s2811_s20  ;;  %p2817_p13 = scmp.lt.s32.totalorder %s2811_s20, %s2811_s20 }
  0x1e   :  { %p2818_p0 = por %p2817_p13, %p2816_p12 }
  0x20   :  { %p2819_p1 = pnand %p2818_p0, %p2812_p11 }
  0x22   :  { %2822 = shalt.err (!%p2819_p1)
}
  0x23   :  { %s2901_s1 = smov 128   ;;  %s2902_s21 = smov 8  }
  0x24   :  { %26 = dma.hbm_to_vmem [thread:$0]  %s3452_s0, 1024, %s21_s12, [#allocation6], %s2901_s1, %s2901_s1, %s2902_s21  }
  0x25   :  { %s2903_s24 = smov [#allocation10]   ;;  %s2904_s26 = smov [#allocation11]  }
  0x26   :  { %s44_s25 = sshll.u32 %s2903_s24, 4  ;;  %s58_s27 = sshll.u32 %s2904_s26, 4  ;;  %s45_s25 = int_to_ptr.vmem [resolvable:$true] %s44_s25  ;;  %s2974_s27 = int_to_ptr.vmem [resolvable:$true] %s58_s27 }
  0x27   :  { %s2823_s30 = scalar_lea.hbm %s3454_s2, 8192 }
  0x28   :  { %p2824_p2 = scmp.ne.s32.totalorder %s3454_s2, %s2823_s30  ;;  %p2827_p3 = scmp.lt.u32.totalorder %s2823_s30, %s3454_s2 }
  0x2a   :  { %p2829_p4 = pnand %p2827_p3, %p2824_p2 }
  0x2c   :  { %2832 = shalt.err (!%p2829_p4)
}
  0x2d   :  { %s2833_s0 = scalar_lea.vmem %s45_s25, 8192  ;;  %p2838_p6 = scmp.lt.s32.totalorder %s45_s25, %s45_s25 }
  0x2e   :  { %p2834_p5 = scmp.ne.s32.totalorder %s45_s25, %s2833_s0  ;;  %p2839_p7 = scmp.lt.s32.totalorder %s2833_s0, %s2833_s0 }
  0x30   :  { %p2840_p8 = por %p2839_p7, %p2838_p6 }
  0x32   :  { %p2841_p9 = pnand %p2840_p8, %p2834_p5 }
  0x34   :  { %2844 = shalt.err (!%p2841_p9)
}
  0x35   :  { %50 = dma.hbm_to_vmem [thread:$0]  %s3454_s2, 8192, %s45_s25, [#allocation9], %s2898_s7, %s2898_s7, %s2899_s8  }
  0x36   :  { %s2845_s17 = scalar_lea.hbm %s3456_s4, 2048 }
  0x37   :  { %p2846_p10 = scmp.ne.s32.totalorder %s3456_s4, %s2845_s17  ;;  %p2849_p11 = scmp.lt.u32.totalorder %s2845_s17, %s3456_s4 }
  0x39   :  { %p2851_p12 = pnand %p2849_p11, %p2846_p10 }
  0x3b   :  { %2854 = shalt.err (!%p2851_p12)
}
  0x3c   :  { %s2855_s23 = scalar_lea.vmem %s2974_s27, 2048  ;;  %p2860_p0 = scmp.lt.s32.totalorder %s2974_s27, %s2974_s27 }
  0x3d   :  { %p2856_p13 = scmp.ne.s32.totalorder %s2974_s27, %s2855_s23  ;;  %p2861_p1 = scmp.lt.s32.totalorder %s2855_s23, %s2855_s23 }
  0x3f   :  { %p2862_p2 = por %p2861_p1, %p2860_p0 }
  0x41   :  { %p2863_p3 = pnand %p2862_p2, %p2856_p13 }
  0x43   :  { %2866 = shalt.err (!%p2863_p3)
}
  0x44   :  { %64 = dma.hbm_to_vmem [thread:$0]  %s3456_s4, 2048, %s2974_s27, [#allocation12], %s2901_s1, %s2901_s1, %s2902_s21  }
  0x45   :  { %2889 = dma.done.wait [#allocation6], 1024  }
  0x46   :  { %2890 = vsyncadd [#allocation6], 4294966272 }
  0x47   :  { %2891 = dma.done.wait [#allocation9], 16384  }
  0x48   :  { %2892 = vsyncadd [#allocation9], 4294950912 }
  0x49   :  { %2893 = dma.done.wait [#allocation12], 2048  }
  0x4a   :  { %2894 = vsyncadd [#allocation12], 4294965248  ;;  %v2905_v0 = vmov 0.0   ;;  %v94_v1 = vld [vmem:[#allocation8 + $0x8] sm:$0xff]  ;;  %v96_v3 = vld [vmem:[#allocation8 + $0x18] sm:$0xff]  ;;  %vm2907_vm0 = vmmov 0  }
  0x4b   :  { %243 = vmatprep.mubr.f32.mxu0 %v2905_v0  ;;  %356 = vmatprep.mubr.f32.mxu1 %v2905_v0  ;;  %v98_v2 = vld [vmem:[#allocation8 + $0x28] sm:$0xff]  ;;  %v100_v5 = vld [vmem:[#allocation8 + $0x38] sm:$0xff]  ;;  %v93_v6 = vld [vmem:[#allocation8] sm:$0xff]  ;;  %s2908_s21 = smov [#allocation13]  }
  0x4c   :  { %v2023_v4 = vpack.c.bf16 %v98_v2, %v94_v1  ;;  %v97_v7 = vld [vmem:[#allocation8 + $0x20] sm:$0xff]  ;;  %v2055_v8 = vpack.c.bf16 %v100_v5, %v96_v3  ;;  %v95_v10 = vld [vmem:[#allocation8 + $0x10] sm:$0xff]  ;;  %v102_v12 = vld [vmem:[#allocation8 + $0x48] sm:$0xff]  ;;  %s1959_s24 = sshll.u32 %s2908_s21, 4  ;;  %s1960_s24 = int_to_ptr.vmem [resolvable:$true] %s1959_s24 }
  0x4d   :  { %v2025_v9 = vpack.c.bf16 %v97_v7, %v93_v6  ;;  %v99_v11 = vld [vmem:[#allocation8 + $0x30] sm:$0xff]  ;;  %v106_v14 = vld [vmem:[#allocation8 + $0x68] sm:$0xff]  ;;  %v104_v15 = vld [vmem:[#allocation8 + $0x58] sm:$0xff]  ;;  %s2867_s25 = scalar_lea.vmem %s1960_s24, 128  ;;  %p2872_p5 = scmp.lt.s32.totalorder %s1960_s24, %s1960_s24 }
  0x4e   :  { %2024 = vmatprep.subr.bf16.mxu0 %v2023_v4  ;;  %v2057_v13 = vpack.c.bf16 %v99_v11, %v95_v10  ;;  %v108_v16 = vld [vmem:[#allocation8 + $0x78] sm:$0xff]  ;;  %2056 = vmatprep.subr.bf16.mxu1 %v2055_v8  ;;  %v2027_v17 = vpack.c.bf16 %v106_v14, %v102_v12  ;;  %v101_v19 = vld [vmem:[#allocation8 + $0x40] sm:$0xff]  ;;  %v103_v21 = vld [vmem:[#allocation8 + $0x50] sm:$0xff]  ;;  %p2868_p4 = scmp.ne.s32.totalorder %s1960_s24, %s2867_s25  ;;  %p2873_p6 = scmp.lt.s32.totalorder %s2867_s25, %s2867_s25 }
  0x4f   :  { %2026 = vmatpush1.bf16.msra.mxu0 %v2025_v9  ;;  %v2059_v18 = vpack.c.bf16 %v108_v16, %v104_v15  ;;  %v105_v20 = vld [vmem:[#allocation8 + $0x60] sm:$0xff]  ;;  %v107_v23 = vld [vmem:[#allocation8 + $0x70] sm:$0xff]  ;;  %v110_v24 = vld [vmem:[#allocation8 + $0x88] sm:$0xff] }
  0x50   :  { %2058 = vmatpush1.bf16.msra.mxu1 %v2057_v13  ;;  %v2029_v22 = vpack.c.bf16 %v105_v20, %v101_v19  ;;  %v114_v25 = vld [vmem:[#allocation8 + $0xa8] sm:$0xff]  ;;  %2028 = vmatprep.subr.bf16.mxu0 %v2027_v17  ;;  %v2061_v26 = vpack.c.bf16 %v107_v23, %v103_v21  ;;  %v112_v28 = vld [vmem:[#allocation8 + $0x98] sm:$0xff]  ;;  %v109_v30 = vld [vmem:[#allocation8 + $0x80] sm:$0xff]  ;;  %p2874_p7 = por %p2873_p6, %p2872_p5 }
  0x51   :  { %2060 = vmatprep.subr.bf16.mxu1 %v2059_v18  ;;  %v2031_v27 = vpack.c.bf16 %v114_v25, %v110_v24  ;;  %v116_v29 = vld [vmem:[#allocation8 + $0xb8] sm:$0xff]  ;;  %v113_v32 = vld [vmem:[#allocation8 + $0xa0] sm:$0xff]  ;;  %v111_v33 = vld [vmem:[#allocation8 + $0x90] sm:$0xff] }
  0x52   :  { %v2063_v31 = vpack.c.bf16 %v116_v29, %v112_v28  ;;  %v115_v34 = vld [vmem:[#allocation8 + $0xb0] sm:$0xff]  ;;  %v2033_v35 = vpack.c.bf16 %v113_v32, %v109_v30  ;;  %v118_v36 = vld [vmem:[#allocation8 + $0xc8] sm:$0xff]  ;;  %v120_v38 = vld [vmem:[#allocation8 + $0xd8] sm:$0xff]  ;;  %p2875_p8 = pnand %p2874_p7, %p2868_p4 }
  0x53   :  { %2030 = vmatpush1.bf16.msra.mxu0 %v2029_v22  ;;  %v122_v37 = vld [vmem:[#allocation8 + $0xe8] sm:$0xff]  ;;  %v2065_v39 = vpack.c.bf16 %v115_v34, %v111_v33  ;;  %v124_v41 = vld [vmem:[#allocation8 + $0xf8] sm:$0xff]  ;;  %v117_v42 = vld [vmem:[#allocation8 + $0xc0] sm:$0xff] }
  0x54   :  { %2062 = vmatpush1.bf16.msra.mxu1 %v2061_v26  ;;  %2032 = vmatprep.subr.bf16.mxu0 %v2031_v27  ;;  %v2035_v40 = vpack.c.bf16 %v122_v37, %v118_v36  ;;  %v121_v43 = vld [vmem:[#allocation8 + $0xe0] sm:$0xff]  ;;  %v2067_v44 = vpack.c.bf16 %v124_v41, %v120_v38  ;;  %v119_v45 = vld [vmem:[#allocation8 + $0xd0] sm:$0xff]  ;;  %v126_v47 = vld [vmem:[#allocation8 + $0x108] sm:$0xff] }
  0x55   :  { %2064 = vmatprep.subr.bf16.mxu1 %v2063_v31  ;;  %v123_v46 = vld [vmem:[#allocation8 + $0xf0] sm:$0xff]  ;;  %v130_v48 = vld [vmem:[#allocation8 + $0x128] sm:$0xff]  ;;  %v128_v49 = vld [vmem:[#allocation8 + $0x118] sm:$0xff]  ;;  %v2037_v51 = vpack.c.bf16 %v121_v43, %v117_v42 }
  0x56   :  { %v132_v50 = vld [vmem:[#allocation8 + $0x138] sm:$0xff]  ;;  %v2069_v52 = vpack.c.bf16 %v123_v46, %v119_v45  ;;  %v2039_v53 = vpack.c.bf16 %v130_v48, %v126_v47  ;;  %v125_v54 = vld [vmem:[#allocation8 + $0x100] sm:$0xff]  ;;  %v127_v56 = vld [vmem:[#allocation8 + $0x110] sm:$0xff] }
  0x57   :  { %2034 = vmatpush1.bf16.msra.mxu0 %v2033_v35  ;;  %v129_v55 = vld [vmem:[#allocation8 + $0x120] sm:$0xff]  ;;  %v2071_v57 = vpack.c.bf16 %v132_v50, %v128_v49  ;;  %v131_v58 = vld [vmem:[#allocation8 + $0x130] sm:$0xff]  ;;  %v134_v59 = vld [vmem:[#allocation8 + $0x148] sm:$0xff] }
  0x58   :  { %2066 = vmatpush1.bf16.msra.mxu1 %v2065_v39  ;;  %2036 = vmatprep.subr.bf16.mxu0 %v2035_v40  ;;  %v138_v60 = vld [vmem:[#allocation8 + $0x168] sm:$0xff]  ;;  %v136_v61 = vld [vmem:[#allocation8 + $0x158] sm:$0xff]  ;;  %v2041_v63 = vpack.c.bf16 %v129_v55, %v125_v54  ;;  %v2073_v1 = vpack.c.bf16 %v131_v58, %v127_v56  ;;  %v133_v3 = vld [vmem:[#allocation8 + $0x140] sm:$0xff] }
  0x59   :  { %2068 = vmatprep.subr.bf16.mxu1 %v2067_v44  ;;  %v140_v62 = vld [vmem:[#allocation8 + $0x178] sm:$0xff]  ;;  %v2043_v2 = vpack.c.bf16 %v138_v60, %v134_v59  ;;  %v137_v4 = vld [vmem:[#allocation8 + $0x160] sm:$0xff]  ;;  %v135_v5 = vld [vmem:[#allocation8 + $0x150] sm:$0xff] }
  0x5a   :  { %v2075_v6 = vpack.c.bf16 %v140_v62, %v136_v61  ;;  %v139_v7 = vld [vmem:[#allocation8 + $0x170] sm:$0xff]  ;;  %v142_v8 = vld [vmem:[#allocation8 + $0x188] sm:$0xff]  ;;  %v144_v10 = vld [vmem:[#allocation8 + $0x198] sm:$0xff]  ;;  %v2045_v12 = vpack.c.bf16 %v137_v4, %v133_v3 }
  0x5b   :  { %2038 = vmatpush1.bf16.msra.mxu0 %v2037_v51  ;;  %v146_v9 = vld [vmem:[#allocation8 + $0x1a8] sm:$0xff]  ;;  %v148_v11 = vld [vmem:[#allocation8 + $0x1b8] sm:$0xff]  ;;  %v2077_v13 = vpack.c.bf16 %v139_v7, %v135_v5  ;;  %v141_v15 = vld [vmem:[#allocation8 + $0x180] sm:$0xff] }
  0x5c   :  { %2070 = vmatpush1.bf16.msra.mxu1 %v2069_v52  ;;  %2040 = vmatprep.subr.bf16.mxu0 %v2039_v53  ;;  %v2047_v14 = vpack.c.bf16 %v146_v9, %v142_v8  ;;  %v145_v16 = vld [vmem:[#allocation8 + $0x1a0] sm:$0xff]  ;;  %v143_v17 = vld [vmem:[#allocation8 + $0x190] sm:$0xff]  ;;  %v2079_v18 = vpack.c.bf16 %v148_v11, %v144_v10  ;;  %v150_v20 = vld [vmem:[#allocation8 + $0x1c8] sm:$0xff] }
  0x5d   :  { %2072 = vmatprep.subr.bf16.mxu1 %v2071_v57  ;;  %v147_v19 = vld [vmem:[#allocation8 + $0x1b0] sm:$0xff]  ;;  %v154_v21 = vld [vmem:[#allocation8 + $0x1e8] sm:$0xff]  ;;  %v152_v22 = vld [vmem:[#allocation8 + $0x1d8] sm:$0xff]  ;;  %v2049_v24 = vpack.c.bf16 %v145_v16, %v141_v15 }
  0x5e   :  { %v156_v23 = vld [vmem:[#allocation8 + $0x1f8] sm:$0xff]  ;;  %v2081_v25 = vpack.c.bf16 %v147_v19, %v143_v17  ;;  %v2051_v26 = vpack.c.bf16 %v154_v21, %v150_v20  ;;  %v149_v27 = vld [vmem:[#allocation8 + $0x1c0] sm:$0xff]  ;;  %v151_v29 = vld [vmem:[#allocation8 + $0x1d0] sm:$0xff] }
  0x5f   :  { %2042 = vmatpush1.bf16.msra.mxu0 %v2041_v63  ;;  %v153_v28 = vld [vmem:[#allocation8 + $0x1e0] sm:$0xff]  ;;  %v2083_v30 = vpack.c.bf16 %v156_v23, %v152_v22  ;;  %v155_v31 = vld [vmem:[#allocation8 + $0x1f0] sm:$0xff]  ;;  %v438_v32 = vld [vmem:[#allocation10 + $0x8] sm:$0xff] }
  0x60   :  { %2074 = vmatpush1.bf16.msra.mxu1 %v2073_v1  ;;  %2044 = vmatprep.subr.bf16.mxu0 %v2043_v2  ;;  %v442_v33 = vld [vmem:[#allocation10 + $0x28] sm:$0xff]  ;;  %v440_v34 = vld [vmem:[#allocation10 + $0x18] sm:$0xff]  ;;  %v2053_v36 = vpack.c.bf16 %v153_v28, %v149_v27  ;;  %v2085_v37 = vpack.c.bf16 %v155_v31, %v151_v29  ;;  %v437_v39 = vld [vmem:[#allocation10] sm:$0xff] }
  0x61   :  { %2076 = vmatprep.subr.bf16.mxu1 %v2075_v6  ;;  %v444_v35 = vld [vmem:[#allocation10 + $0x38] sm:$0xff]  ;;  %v3013_v38 = vpack.c.bf16 %v442_v33, %v438_v32  ;;  %v441_v40 = vld [vmem:[#allocation10 + $0x20] sm:$0xff]  ;;  %v439_v42 = vld [vmem:[#allocation10 + $0x10] sm:$0xff] }
  0x62   :  { %v3015_v41 = vpack.c.bf16 %v444_v35, %v440_v34  ;;  %v443_v43 = vld [vmem:[#allocation10 + $0x30] sm:$0xff]  ;;  %v446_v44 = vld [vmem:[#allocation10 + $0x48] sm:$0xff]  ;;  %v85_v46 = vld [vmem:[#allocation5] sm:$0xff]  ;;  %v3017_v47 = vpack.c.bf16 %v441_v40, %v437_v39 }
  0x63   :  { %2046 = vmatpush1.bf16.msra.mxu0 %v2045_v12  ;;  %v450_v45 = vld [vmem:[#allocation10 + $0x68] sm:$0xff]  ;;  %v448_v48 = vld [vmem:[#allocation10 + $0x58] sm:$0xff]  ;;  %v3020_v50 = vpack.c.bf16 %v443_v43, %v439_v42  ;;  %v445_v51 = vld [vmem:[#allocation10 + $0x40] sm:$0xff] }
  0x64   :  { %2078 = vmatpush1.bf16.msra.mxu1 %v2077_v13  ;;  %2048 = vmatprep.subr.bf16.mxu0 %v2047_v14  ;;  %v452_v49 = vld [vmem:[#allocation10 + $0x78] sm:$0xff]  ;;  %v449_v52 = vld [vmem:[#allocation10 + $0x60] sm:$0xff]  ;;  %v3023_v53 = vpack.c.bf16 %v450_v45, %v446_v44  ;;  %v447_v54 = vld [vmem:[#allocation10 + $0x50] sm:$0xff] }
  0x65   :  { %2080 = vmatprep.subr.bf16.mxu1 %v2079_v18  ;;  %v451_v55 = vld [vmem:[#allocation10 + $0x70] sm:$0xff]  ;;  %v3025_v56 = vpack.c.bf16 %v452_v49, %v448_v48  ;;  %v454_v57 = vld [vmem:[#allocation10 + $0x88] sm:$0xff]  ;;  %v3028_v60 = vpack.c.bf16 %v449_v52, %v445_v51  ;;  %v456_v61 = vld [vmem:[#allocation10 + $0x98] sm:$0xff] }
  0x66   :  { %v458_v58 = vld [vmem:[#allocation10 + $0xa8] sm:$0xff]  ;;  %v460_v62 = vld [vmem:[#allocation10 + $0xb8] sm:$0xff]  ;;  %v3032_v63 = vpack.c.bf16 %v451_v55, %v447_v54  ;;  %v453_v1 = vld [vmem:[#allocation10 + $0x80] sm:$0xff] }
  0x67   :  { %2050 = vmatpush1.bf16.msra.mxu0 %v2049_v24  ;;  %v86_v59 = vld [vmem:[#allocation5 + $0x8] sm:$0xff]  ;;  %v457_v2 = vld [vmem:[#allocation10 + $0xa0] sm:$0xff]  ;;  %v3036_v3 = vpack.c.bf16 %v458_v58, %v454_v57  ;;  %v455_v4 = vld [vmem:[#allocation10 + $0x90] sm:$0xff]  ;;  %v3039_v6 = vpack.c.bf16 %v460_v62, %v456_v61 }
  0x68   :  { %2082 = vmatpush1.bf16.msra.mxu1 %v2081_v25  ;;  %2052 = vmatprep.subr.bf16.mxu0 %v2051_v26  ;;  %v459_v5 = vld [vmem:[#allocation10 + $0xb0] sm:$0xff]  ;;  %v462_v7 = vld [vmem:[#allocation10 + $0xc8] sm:$0xff]  ;;  %v3042_v10 = vpack.c.bf16 %v457_v2, %v453_v1  ;;  %v464_v11 = vld [vmem:[#allocation10 + $0xd8] sm:$0xff] }
  0x69   :  { %2084 = vmatprep.subr.bf16.mxu1 %v2083_v30  ;;  %v466_v8 = vld [vmem:[#allocation10 + $0xe8] sm:$0xff]  ;;  %v87_v9 = vld [vmem:[#allocation5 + $0x10] sm:$0xff]  ;;  %v468_v12 = vld [vmem:[#allocation10 + $0xf8] sm:$0xff]  ;;  %v3046_v13 = vpack.c.bf16 %v459_v5, %v455_v4 }
  0x6a   :  { %v461_v14 = vld [vmem:[#allocation10 + $0xc0] sm:$0xff]  ;;  %v3050_v16 = vpack.c.bf16 %v466_v8, %v462_v7  ;;  %v463_v17 = vld [vmem:[#allocation10 + $0xd0] sm:$0xff]  ;;  %v3053_v19 = vpack.c.bf16 %v468_v12, %v464_v11  ;;  %v470_v20 = vld [vmem:[#allocation10 + $0x108] sm:$0xff] }
  0x6b   :  { %2054 = vmatpush1.bf16.msra.mxu0 %v2053_v36  ;;  %v465_v15 = vld [vmem:[#allocation10 + $0xe0] sm:$0xff]  ;;  %v467_v18 = vld [vmem:[#allocation10 + $0xf0] sm:$0xff]  ;;  %v474_v21 = vld [vmem:[#allocation10 + $0x128] sm:$0xff] }
  0x6c   :  { %2086 = vmatpush1.bf16.msra.mxu1 %v2085_v37  ;;  %2088 = vmatprep.subr.bf16.mxu0 %v3013_v38  ;;  %v88_v22 = vld [vmem:[#allocation5 + $0x18] sm:$0xff]  ;;  %v3056_v23 = vpack.c.bf16 %v465_v15, %v461_v14  ;;  %v3060_v26 = vpack.c.bf16 %v467_v18, %v463_v17  ;;  %v469_v27 = vld [vmem:[#allocation10 + $0x100] sm:$0xff]  ;;  %v3064_v29 = vpack.c.bf16 %v474_v21, %v470_v20  ;;  %v471_v30 = vld [vmem:[#allocation10 + $0x110] sm:$0xff] }
  0x6d   :  { %2120 = vmatprep.subr.bf16.mxu1 %v3015_v41  ;;  %v472_v24 = vld [vmem:[#allocation10 + $0x118] sm:$0xff]  ;;  %v473_v28 = vld [vmem:[#allocation10 + $0x120] sm:$0xff]  ;;  %v475_v31 = vld [vmem:[#allocation10 + $0x130] sm:$0xff] }
  0x6e   :  { %244 = vmatmul.mubr.f32.vlgmr.msra.gmra.mrb[0].mxu0 %v85_v46  ;;  %v476_v25 = vld [vmem:[#allocation10 + $0x138] sm:$0xff]  ;;  %v478_v33 = vld [vmem:[#allocation10 + $0x148] sm:$0xff]  ;;  %v89_v35 = vld [vmem:[#allocation5 + $0x20] sm:$0xff]  ;;  %v3070_v36 = vpack.c.bf16 %v473_v28, %v469_v27  ;;  %v3074_v40 = vpack.c.bf16 %v475_v31, %v471_v30  ;;  %v159_v28 = vlaneseq }
  0x6f   :  { %357 = vmatmul.mubr.f32.vlgmr.msra.gmra.mrb[0].mxu1 %v85_v46  ;;  %2090 = vmatpush1.bf16.msra.mxu0 %v3017_v47  ;;  %v3067_v32 = vpack.c.bf16 %v476_v25, %v472_v24  ;;  %v482_v34 = vld [vmem:[#allocation10 + $0x168] sm:$0xff]  ;;  %v480_v37 = vld [vmem:[#allocation10 + $0x158] sm:$0xff]  ;;  %v477_v42 = vld [vmem:[#allocation10 + $0x140] sm:$0xff] }
  0x70   :  { %2122 = vmatpush1.bf16.msra.mxu1 %v3020_v50  ;;  %249 = vmatprep.mubr.f32.mxu0 %v2905_v0  ;;  %v484_v39 = vld [vmem:[#allocation10 + $0x178] sm:$0xff]  ;;  %v481_v43 = vld [vmem:[#allocation10 + $0x160] sm:$0xff]  ;;  %v3078_v44 = vpack.c.bf16 %v482_v34, %v478_v33  ;;  %v479_v45 = vld [vmem:[#allocation10 + $0x150] sm:$0xff]  ;;  %v160_v30 = vshrl.u32 %v159_v28, 7 }
  0x71   :  { %362 = vmatprep.mubr.f32.mxu1 %v2905_v0  ;;  %2092 = vmatprep.subr.bf16.mxu0 %v3023_v53  ;;  %v483_v46 = vld [vmem:[#allocation10 + $0x170] sm:$0xff]  ;;  %v3081_v48 = vpack.c.bf16 %v484_v39, %v480_v37  ;;  %v486_v49 = vld [vmem:[#allocation10 + $0x188] sm:$0xff]  ;;  %v3084_v54 = vpack.c.bf16 %v481_v43, %v477_v42  ;;  %v488_v55 = vld [vmem:[#allocation10 + $0x198] sm:$0xff] }
  0x72   :  { %250 = vmatmul.mubr.f32.gmra.mrb[2].mxu0 %v86_v59  ;;  %2124 = vmatprep.subr.bf16.mxu1 %v3025_v56  ;;  %v490_v51 = vld [vmem:[#allocation10 + $0x1a8] sm:$0xff]  ;;  %v492_v57 = vld [vmem:[#allocation10 + $0x1b8] sm:$0xff]  ;;  %v3088_v58 = vpack.c.bf16 %v483_v46, %v479_v45  ;;  %v489_v61 = vld [vmem:[#allocation10 + $0x1a0] sm:$0xff]  ;;  %v161_v31 = vsub.s32 0, %v160_v30  ;;  %v165_v34 = vsub.s32 1, %v160_v30  ;;  %v173_v37 = vsub.s32 3, %v160_v30 }
  0x73   :  { %363 = vmatmul.mubr.f32.gmra.mrb[2].mxu1 %v86_v59  ;;  %2094 = vmatpush1.bf16.msra.mxu0 %v3028_v60  ;;  %v90_v52 = vld [vmem:[#allocation5 + $0x28] sm:$0xff]  ;;  %v485_v59 = vld [vmem:[#allocation10 + $0x180] sm:$0xff]  ;;  %v3092_v62 = vpack.c.bf16 %v490_v51, %v486_v49  ;;  %v487_v1 = vld [vmem:[#allocation10 + $0x190] sm:$0xff]  ;;  %v3095_v4 = vpack.c.bf16 %v492_v57, %v488_v55  ;;  %v169_v51 = vsub.s32 2, %v160_v30 }
  0x74   :  { %2126 = vmatpush1.bf16.msra.mxu1 %v3032_v63  ;;  %255 = vmatprep.mubr.f32.mxu0 %v2905_v0  ;;  %v491_v2 = vld [vmem:[#allocation10 + $0x1b0] sm:$0xff]  ;;  %v494_v5 = vld [vmem:[#allocation10 + $0x1c8] sm:$0xff]  ;;  %v496_v11 = vld [vmem:[#allocation10 + $0x1d8] sm:$0xff] }
  0x75   :  { %368 = vmatprep.mubr.f32.mxu1 %v2905_v0  ;;  %2096 = vmatprep.subr.bf16.mxu0 %v3036_v3  ;;  %v498_v7 = vld [vmem:[#allocation10 + $0x1e8] sm:$0xff]  ;;  %v91_v8 = vld [vmem:[#allocation5 + $0x30] sm:$0xff]  ;;  %v500_v12 = vld [vmem:[#allocation10 + $0x1f8] sm:$0xff]  ;;  %v3102_v14 = vpack.c.bf16 %v491_v2, %v487_v1 }
  0x76   :  { %256 = vmatmul.mubr.f32.gmra.mrb[4].mxu0 %v87_v9  ;;  %2128 = vmatprep.subr.bf16.mxu1 %v3039_v6  ;;  %v493_v15 = vld [vmem:[#allocation10 + $0x1c0] sm:$0xff]  ;;  %v3106_v18 = vpack.c.bf16 %v498_v7, %v494_v5  ;;  %v495_v20 = vld [vmem:[#allocation10 + $0x1d0] sm:$0xff]  ;;  %v92_v24 = vld [vmem:[#allocation5 + $0x38] sm:$0xff] }
  0x77   :  { %369 = vmatmul.mubr.f32.gmra.mrb[4].mxu1 %v87_v9  ;;  %2098 = vmatpush1.bf16.msra.mxu0 %v3042_v10  ;;  %v3098_v9 = vpack.c.bf16 %v489_v61, %v485_v59  ;;  %v497_v17 = vld [vmem:[#allocation10 + $0x1e0] sm:$0xff]  ;;  %v499_v21 = vld [vmem:[#allocation10 + $0x1f0] sm:$0xff] }
  0x78   :  { %2130 = vmatpush1.bf16.msra.mxu1 %v3046_v13  ;;  %261 = vmatprep.mubr.f32.mxu0 %v2905_v0  ;;  %v3112_v25 = vpack.c.bf16 %v497_v17, %v493_v15  ;;  %v3116_v27 = vpack.c.bf16 %v499_v21, %v495_v20  ;;  %v157_v33 = vld [vmem:[%s3455_s3] sm:$0xf] }
  0x79   :  { %374 = vmatprep.mubr.f32.mxu1 %v2905_v0  ;;  %2100 = vmatprep.subr.bf16.mxu0 %v3050_v16  ;;  %v3168_v39 = vrot.slane %v157_v33, %v165_v34  ;;  %v3171_v49 = vrot.slane %v157_v33, %v173_v37  ;;  %v3175_v1 = vrot.slane %v157_v33, %v169_v51 }
  0x7a   :  { %262 = vmatmul.mubr.f32.gmra.mrb[6].mxu0 %v88_v22  ;;  %2132 = vmatprep.subr.bf16.mxu1 %v3053_v19 }
  0x7b   :  { %375 = vmatmul.mubr.f32.gmra.mrb[6].mxu1 %v88_v22  ;;  %2102 = vmatpush1.bf16.msra.mxu0 %v3056_v23  ;;  %v3109_v22 = vpack.c.bf16 %v500_v12, %v496_v11 }
  0x7c   :  { %2134 = vmatpush1.bf16.msra.mxu1 %v3060_v26  ;;  %267 = vmatprep.mubr.f32.mxu0 %v2905_v0 }
  0x7d   :  { %380 = vmatprep.mubr.f32.mxu1 %v2905_v0  ;;  %2104 = vmatprep.subr.bf16.mxu0 %v3064_v29 }
  0x7e   :  { %268 = vmatmul.mubr.f32.gmra.mrb[8].mxu0 %v89_v35  ;;  %2136 = vmatprep.subr.bf16.mxu1 %v3067_v32 }
  0x7f   :  { %381 = vmatmul.mubr.f32.gmra.mrb[8].mxu1 %v89_v35  ;;  %2106 = vmatpush1.bf16.msra.mxu0 %v3070_v36  ;;  %v3166_v35 = vrot.slane %v157_v33, %v161_v31 }
  0x80   :  { %2138 = vmatpush1.bf16.msra.mxu1 %v3074_v40  ;;  %273 = vmatprep.mubr.f32.mxu0 %v2905_v0 }
  0x81   :  { %386 = vmatprep.mubr.f32.mxu1 %v2905_v0  ;;  %2108 = vmatprep.subr.bf16.mxu0 %v3078_v44 }
  0x82   :  { %274 = vmatmul.mubr.f32.gmra.mrb[10].mxu0 %v90_v52  ;;  %2140 = vmatprep.subr.bf16.mxu1 %v3081_v48 }
  0x83   :  { %387 = vmatmul.mubr.f32.gmra.mrb[10].mxu1 %v90_v52  ;;  %2110 = vmatpush1.bf16.msra.mxu0 %v3084_v54 }
  0x84   :  { %2142 = vmatpush1.bf16.msra.mxu1 %v3088_v58  ;;  %279 = vmatprep.mubr.f32.mxu0 %v2905_v0 }
  0x85   :  { %392 = vmatprep.mubr.f32.mxu1 %v2905_v0  ;;  %2112 = vmatprep.subr.bf16.mxu0 %v3092_v62 }
  0x86   :  { %280 = vmatmul.mubr.f32.gmra.mrb[12].mxu0 %v91_v8  ;;  %2144 = vmatprep.subr.bf16.mxu1 %v3095_v4 }
  0x87   :  { %393 = vmatmul.mubr.f32.gmra.mrb[12].mxu1 %v91_v8  ;;  %2114 = vmatpush1.bf16.msra.mxu0 %v3098_v9 }
  0x88   :  { %2146 = vmatpush1.bf16.msra.mxu1 %v3102_v14  ;;  %285 = vmatprep.mubr.f32.mxu0 %v2905_v0 }
  0x89   :  { %398 = vmatprep.mubr.f32.mxu1 %v2905_v0  ;;  %2116 = vmatprep.subr.bf16.mxu0 %v3106_v18 }
  0x8a   :  { %286 = vmatmul.mubr.f32.gmra.mrb[14].mxu0 %v92_v24  ;;  %2148 = vmatprep.subr.bf16.mxu1 %v3109_v22 }
  0x8b   :  { %399 = vmatmul.mubr.f32.gmra.mrb[14].mxu1 %v92_v24  ;;  %2118 = vmatpush1.bf16.msra.mxu0 %v3112_v25 }
  0x8c   :  { %2150 = vmatpush1.bf16.msra.mxu1 %v3116_v27  ;;  %571 = vmatprep.mubr.f32.mxu0 %v2905_v0 }
  0x8d   :  { %642 = vmatprep.mubr.f32.mxu1 %v2905_v0  ;;  %2152 = vmatprep.subr.bf16.mxu0 %v3013_v38 }
  0x8e   :  { %572 = vmatmul.mubr.f32.vlgmr.msra.gmra.mrb[0].mxu0 %v2905_v0  ;;  %2184 = vmatprep.subr.bf16.mxu1 %v3015_v41 }
  0x8f   :  { %643 = vmatmul.mubr.f32.vlgmr.msra.gmra.mrb[0].mxu1 %v2905_v0  ;;  %2154 = vmatpush1.bf16.msra.mxu0 %v3017_v47 }
  0x90   :  { %2186 = vmatpush1.bf16.msra.mxu1 %v3020_v50  ;;  %2156 = vmatprep.subr.bf16.mxu0 %v3023_v53 }
  0x91   :  { %2188 = vmatprep.subr.bf16.mxu1 %v3025_v56  ;;  %740 = vmatprep.mubr.f32.mxu0 %v2905_v0 }
  0x92   :  { %811 = vmatprep.mubr.f32.mxu1 %v2905_v0 }
  0x93   :  { %2158 = vmatpush1.bf16.msra.mxu0 %v3028_v60 }
  0x94   :  { %2190 = vmatpush1.bf16.msra.mxu1 %v3032_v63  ;;  %2160 = vmatprep.subr.bf16.mxu0 %v3036_v3 }
  0x95   :  { %2192 = vmatprep.subr.bf16.mxu1 %v3039_v6 }
  0x97   :  { %2162 = vmatpush1.bf16.msra.mxu0 %v3042_v10 }
  0x98   :  { %2194 = vmatpush1.bf16.msra.mxu1 %v3046_v13  ;;  %2164 = vmatprep.subr.bf16.mxu0 %v3050_v16 }
  0x99   :  { %2196 = vmatprep.subr.bf16.mxu1 %v3053_v19 }
  0x9b   :  { %2166 = vmatpush1.bf16.msra.mxu0 %v3056_v23 }
  0x9c   :  { %2198 = vmatpush1.bf16.msra.mxu1 %v3060_v26  ;;  %2168 = vmatprep.subr.bf16.mxu0 %v3064_v29 }
  0x9d   :  { %2200 = vmatprep.subr.bf16.mxu1 %v3067_v32 }
  0x9f   :  { %2170 = vmatpush1.bf16.msra.mxu0 %v3070_v36 }
  0xa0   :  { %2202 = vmatpush1.bf16.msra.mxu1 %v3074_v40  ;;  %2172 = vmatprep.subr.bf16.mxu0 %v3078_v44 }
  0xa1   :  { %2204 = vmatprep.subr.bf16.mxu1 %v3081_v48 }
  0xa3   :  { %2174 = vmatpush1.bf16.msra.mxu0 %v3084_v54 }
  0xa4   :  { %2206 = vmatpush1.bf16.msra.mxu1 %v3088_v58  ;;  %2176 = vmatprep.subr.bf16.mxu0 %v3092_v62 }
  0xa5   :  { %2208 = vmatprep.subr.bf16.mxu1 %v3095_v4 }
  0xa7   :  { %2178 = vmatpush1.bf16.msra.mxu0 %v3098_v9 }
  0xa8   :  { %2210 = vmatpush1.bf16.msra.mxu1 %v3102_v14  ;;  %2180 = vmatprep.subr.bf16.mxu0 %v3106_v18 }
  0xa9   :  { %2212 = vmatprep.subr.bf16.mxu1 %v3109_v22 }
  0xab   :  { %2182 = vmatpush1.bf16.msra.mxu0 %v3112_v25 }
  0xac   :  { %2214 = vmatpush1.bf16.msra.mxu1 %v3116_v27  ;;  %2216 = vmatprep.subr.bf16.mxu0 %v3013_v38 }
  0xad   :  { %2248 = vmatprep.subr.bf16.mxu1 %v3015_v41 }
 0x161   :  { %v573_v42 = vpop.f32.mrb[0].mxu0 }
 0x162   :  { %v2623_v43 = vadd.f32 %v573_v42, %v3166_v35  ;;  %v644_v45 = vpop.f32.mrb[0].mxu1  ;;  %v575_v46 = vpop.f32.mrb[1].mxu0 }
 0x163   :  { %v2624_v52 = vadd.f32 %v575_v46, %v3168_v39  ;;  %v646_v55 = vpop.f32.mrb[1].mxu1  ;;  %v2639_v2 = vadd.f32 %v644_v45, %v3175_v1 }
 0x164   :  { %v653_v57 = vmul.f32 0.5, %v2623_v43  ;;  %v2640_v61 = vadd.f32 %v646_v55, %v3171_v49 }
 0x165   :  { %v654_v59 = vmul.f32 0.5, %v2624_v52  ;;  %v655_v5 = vmul.f32 0.5, %v2639_v2 }
 0x166   :  { %2699 = vtanh.f32 %v653_v57 }
 0x167   :  { %2701 = vtanh.f32 %v654_v59 }
 0x168   :  { %2703 = vtanh.f32 %v2640_v61 }
 0x169   :  { %2705 = vtanh.f32 %v655_v5 }
 0x170   :  { %v2700_v7 = vpop.eup %2699 }
 0x171   :  { %v659_v8 = vadd.f32 1.0, %v2700_v7  ;;  %v2702_v11 = vpop.eup %2701 }
 0x172   :  { %v660_v15 = vadd.f32 1.0, %v2702_v11  ;;  %v2704_v17 = vpop.eup %2703 }
 0x173   :  { %v662_v12 = vmul.f32 0.5, %v659_v8  ;;  %v2706_v30 = vpop.eup %2705 }
 0x174   :  { %v663_v20 = vmul.f32 0.5, %v660_v15  ;;  %v661_v31 = vadd.f32 1.0, %v2706_v30 }
 0x175   :  { %v667_v21 = vmul.f32 %v2704_v17, %v662_v12 }
 0x176   :  { %v666_v24 = vmul.f32 0.0, %v663_v20  ;;  %v664_v33 = vmul.f32 0.5, %v661_v31 }
 0x178   :  { %v3178_v28 = vadd.f32 %v667_v21, %v666_v24 }
 0x17a   :  { %2707 = vtanh.f32 %v3178_v28 }
 0x184   :  { %v2708_v34 = vpop.eup %2707 }
 0x185   :  { %v670_v37 = vmul.f32 %v2708_v34, %v664_v33 }
 0x187   :  { %741 = vmatmul.mubr.f32.vlgmr.msra.gmra.mrb[2].mxu0 %v670_v37  ;;  %812 = vmatmul.mubr.f32.vlgmr.msra.gmra.mrb[2].mxu1 %v670_v37 }
 0x188   :  { %2218 = vmatpush1.bf16.msra.mxu0 %v3017_v47  ;;  %2250 = vmatpush1.bf16.msra.mxu1 %v3020_v50 }
 0x189   :  { %2220 = vmatprep.subr.bf16.mxu0 %v3023_v53  ;;  %2252 = vmatprep.subr.bf16.mxu1 %v3025_v56 }
 0x18a   :  { %909 = vmatprep.mubr.f32.mxu0 %v2905_v0  ;;  %980 = vmatprep.mubr.f32.mxu1 %v2905_v0 }
 0x18c   :  { %2222 = vmatpush1.bf16.msra.mxu0 %v3028_v60  ;;  %2254 = vmatpush1.bf16.msra.mxu1 %v3032_v63 }
 0x18d   :  { %2224 = vmatprep.subr.bf16.mxu0 %v3036_v3  ;;  %2256 = vmatprep.subr.bf16.mxu1 %v3039_v6 }
 0x190   :  { %2226 = vmatpush1.bf16.msra.mxu0 %v3042_v10  ;;  %2258 = vmatpush1.bf16.msra.mxu1 %v3046_v13 }
 0x191   :  { %2228 = vmatprep.subr.bf16.mxu0 %v3050_v16  ;;  %2260 = vmatprep.subr.bf16.mxu1 %v3053_v19 }
 0x194   :  { %2230 = vmatpush1.bf16.msra.mxu0 %v3056_v23  ;;  %2262 = vmatpush1.bf16.msra.mxu1 %v3060_v26 }
 0x195   :  { %2232 = vmatprep.subr.bf16.mxu0 %v3064_v29  ;;  %2264 = vmatprep.subr.bf16.mxu1 %v3067_v32 }
 0x198   :  { %2234 = vmatpush1.bf16.msra.mxu0 %v3070_v36  ;;  %2266 = vmatpush1.bf16.msra.mxu1 %v3074_v40 }
 0x199   :  { %2236 = vmatprep.subr.bf16.mxu0 %v3078_v44  ;;  %2268 = vmatprep.subr.bf16.mxu1 %v3081_v48 }
 0x19c   :  { %2238 = vmatpush1.bf16.msra.mxu0 %v3084_v54  ;;  %2270 = vmatpush1.bf16.msra.mxu1 %v3088_v58 }
 0x19d   :  { %2240 = vmatprep.subr.bf16.mxu0 %v3092_v62  ;;  %2272 = vmatprep.subr.bf16.mxu1 %v3095_v4 }
 0x1a0   :  { %2242 = vmatpush1.bf16.msra.mxu0 %v3098_v9  ;;  %2274 = vmatpush1.bf16.msra.mxu1 %v3102_v14 }
 0x1a1   :  { %2244 = vmatprep.subr.bf16.mxu0 %v3106_v18  ;;  %2276 = vmatprep.subr.bf16.mxu1 %v3109_v22 }
 0x1a4   :  { %2246 = vmatpush1.bf16.msra.mxu0 %v3112_v25  ;;  %2278 = vmatpush1.bf16.msra.mxu1 %v3116_v27 }
 0x1a5   :  { %2280 = vmatprep.subr.bf16.mxu0 %v3013_v38  ;;  %2312 = vmatprep.subr.bf16.mxu1 %v3015_v41 }
 0x25a   :  { %v742_v42 = vpop.f32.mrb[2].mxu0  ;;  %v813_v43 = vpop.f32.mrb[2].mxu1 }
 0x25b   :  { %v2625_v45 = vadd.f32 %v742_v42, %v3166_v35  ;;  %v744_v46 = vpop.f32.mrb[3].mxu0  ;;  %v815_v51 = vpop.f32.mrb[3].mxu1  ;;  %v2641_v61 = vadd.f32 %v813_v43, %v3175_v1 }
 0x25c   :  { %v2626_v52 = vadd.f32 %v744_v46, %v3168_v39  ;;  %v2642_v59 = vadd.f32 %v815_v51, %v3171_v49 }
 0x25d   :  { %v822_v55 = vmul.f32 0.5, %v2625_v45  ;;  %v824_v2 = vmul.f32 0.5, %v2641_v61 }
 0x25e   :  { %v823_v57 = vmul.f32 0.5, %v2626_v52 }
 0x25f   :  { %2709 = vtanh.f32 %v822_v55 }
 0x260   :  { %2711 = vtanh.f32 %v823_v57 }
 0x261   :  { %2713 = vtanh.f32 %v2642_v59 }
 0x262   :  { %2715 = vtanh.f32 %v824_v2 }
 0x269   :  { %v2710_v5 = vpop.eup %2709 }
 0x26a   :  { %v828_v7 = vadd.f32 1.0, %v2710_v5  ;;  %v2712_v8 = vpop.eup %2711 }
 0x26b   :  { %v829_v12 = vadd.f32 1.0, %v2712_v8  ;;  %v2714_v15 = vpop.eup %2713 }
 0x26c   :  { %v831_v11 = vmul.f32 0.5, %v828_v7  ;;  %v2716_v30 = vpop.eup %2715 }
 0x26d   :  { %v832_v17 = vmul.f32 0.5, %v829_v12  ;;  %v830_v31 = vadd.f32 1.0, %v2716_v30 }
 0x26e   :  { %v836_v20 = vmul.f32 %v2714_v15, %v831_v11 }
 0x26f   :  { %v835_v21 = vmul.f32 %v832_v17, %v3178_v28  ;;  %v833_v33 = vmul.f32 0.5, %v830_v31 }
 0x271   :  { %v3220_v24 = vadd.f32 %v836_v20, %v835_v21 }
 0x273   :  { %2717 = vtanh.f32 %v3220_v24 }
 0x27d   :  { %v2718_v34 = vpop.eup %2717 }
 0x27e   :  { %v839_v37 = vmul.f32 %v2718_v34, %v833_v33 }
 0x280   :  { %910 = vmatmul.mubr.f32.vlgmr.msra.gmra.mrb[4].mxu0 %v839_v37  ;;  %981 = vmatmul.mubr.f32.vlgmr.msra.gmra.mrb[4].mxu1 %v839_v37 }
 0x281   :  { %2282 = vmatpush1.bf16.msra.mxu0 %v3017_v47  ;;  %2314 = vmatpush1.bf16.msra.mxu1 %v3020_v50 }
 0x282   :  { %2284 = vmatprep.subr.bf16.mxu0 %v3023_v53  ;;  %2316 = vmatprep.subr.bf16.mxu1 %v3025_v56 }
 0x283   :  { %1078 = vmatprep.mubr.f32.mxu0 %v2905_v0  ;;  %1149 = vmatprep.mubr.f32.mxu1 %v2905_v0 }
 0x285   :  { %2286 = vmatpush1.bf16.msra.mxu0 %v3028_v60  ;;  %2318 = vmatpush1.bf16.msra.mxu1 %v3032_v63 }
 0x286   :  { %2288 = vmatprep.subr.bf16.mxu0 %v3036_v3  ;;  %2320 = vmatprep.subr.bf16.mxu1 %v3039_v6 }
 0x289   :  { %2290 = vmatpush1.bf16.msra.mxu0 %v3042_v10  ;;  %2322 = vmatpush1.bf16.msra.mxu1 %v3046_v13 }
 0x28a   :  { %2292 = vmatprep.subr.bf16.mxu0 %v3050_v16  ;;  %2324 = vmatprep.subr.bf16.mxu1 %v3053_v19 }
 0x28d   :  { %2294 = vmatpush1.bf16.msra.mxu0 %v3056_v23  ;;  %2326 = vmatpush1.bf16.msra.mxu1 %v3060_v26 }
 0x28e   :  { %2296 = vmatprep.subr.bf16.mxu0 %v3064_v29  ;;  %2328 = vmatprep.subr.bf16.mxu1 %v3067_v32 }
 0x291   :  { %2298 = vmatpush1.bf16.msra.mxu0 %v3070_v36  ;;  %2330 = vmatpush1.bf16.msra.mxu1 %v3074_v40 }
 0x292   :  { %2300 = vmatprep.subr.bf16.mxu0 %v3078_v44  ;;  %2332 = vmatprep.subr.bf16.mxu1 %v3081_v48 }
 0x295   :  { %2302 = vmatpush1.bf16.msra.mxu0 %v3084_v54  ;;  %2334 = vmatpush1.bf16.msra.mxu1 %v3088_v58 }
 0x296   :  { %2304 = vmatprep.subr.bf16.mxu0 %v3092_v62  ;;  %2336 = vmatprep.subr.bf16.mxu1 %v3095_v4 }
 0x299   :  { %2306 = vmatpush1.bf16.msra.mxu0 %v3098_v9  ;;  %2338 = vmatpush1.bf16.msra.mxu1 %v3102_v14 }
 0x29a   :  { %2308 = vmatprep.subr.bf16.mxu0 %v3106_v18  ;;  %2340 = vmatprep.subr.bf16.mxu1 %v3109_v22 }
 0x29d   :  { %2310 = vmatpush1.bf16.msra.mxu0 %v3112_v25  ;;  %2342 = vmatpush1.bf16.msra.mxu1 %v3116_v27 }
 0x29e   :  { %2344 = vmatprep.subr.bf16.mxu0 %v3013_v38  ;;  %2376 = vmatprep.subr.bf16.mxu1 %v3015_v41 }
 0x353   :  { %v911_v28 = vpop.f32.mrb[4].mxu0  ;;  %v982_v42 = vpop.f32.mrb[4].mxu1 }
 0x354   :  { %v2627_v43 = vadd.f32 %v911_v28, %v3166_v35  ;;  %v913_v45 = vpop.f32.mrb[5].mxu0  ;;  %v984_v46 = vpop.f32.mrb[5].mxu1  ;;  %v2643_v59 = vadd.f32 %v982_v42, %v3175_v1 }
 0x355   :  { %v2628_v51 = vadd.f32 %v913_v45, %v3168_v39  ;;  %v2644_v57 = vadd.f32 %v984_v46, %v3171_v49 }
 0x356   :  { %v991_v52 = vmul.f32 0.5, %v2627_v43  ;;  %v993_v61 = vmul.f32 0.5, %v2643_v59 }
 0x357   :  { %v992_v55 = vmul.f32 0.5, %v2628_v51 }
 0x358   :  { %2719 = vtanh.f32 %v991_v52 }
 0x359   :  { %2721 = vtanh.f32 %v992_v55 }
 0x35a   :  { %2723 = vtanh.f32 %v2644_v57 }
 0x35b   :  { %2725 = vtanh.f32 %v993_v61 }
 0x362   :  { %v2720_v2 = vpop.eup %2719 }
 0x363   :  { %v997_v5 = vadd.f32 1.0, %v2720_v2  ;;  %v2722_v7 = vpop.eup %2721 }
 0x364   :  { %v998_v11 = vadd.f32 1.0, %v2722_v7  ;;  %v2724_v12 = vpop.eup %2723 }
 0x365   :  { %v1000_v8 = vmul.f32 0.5, %v997_v5  ;;  %v2726_v30 = vpop.eup %2725 }
 0x366   :  { %v1001_v15 = vmul.f32 0.5, %v998_v11  ;;  %v999_v31 = vadd.f32 1.0, %v2726_v30 }
 0x367   :  { %v1005_v17 = vmul.f32 %v2724_v12, %v1000_v8 }
 0x368   :  { %v1004_v20 = vmul.f32 %v1001_v15, %v3220_v24  ;;  %v1002_v33 = vmul.f32 0.5, %v999_v31 }
 0x36a   :  { %v3262_v21 = vadd.f32 %v1005_v17, %v1004_v20 }
 0x36c   :  { %2727 = vtanh.f32 %v3262_v21 }
 0x376   :  { %v2728_v34 = vpop.eup %2727 }
 0x377   :  { %v1008_v37 = vmul.f32 %v2728_v34, %v1002_v33 }
 0x379   :  { %1079 = vmatmul.mubr.f32.vlgmr.msra.gmra.mrb[6].mxu0 %v1008_v37  ;;  %1150 = vmatmul.mubr.f32.vlgmr.msra.gmra.mrb[6].mxu1 %v1008_v37 }
 0x37a   :  { %2346 = vmatpush1.bf16.msra.mxu0 %v3017_v47  ;;  %2378 = vmatpush1.bf16.msra.mxu1 %v3020_v50 }
 0x37b   :  { %2348 = vmatprep.subr.bf16.mxu0 %v3023_v53  ;;  %2380 = vmatprep.subr.bf16.mxu1 %v3025_v56 }
 0x37c   :  { %1247 = vmatprep.mubr.f32.mxu0 %v2905_v0  ;;  %1318 = vmatprep.mubr.f32.mxu1 %v2905_v0 }
 0x37e   :  { %2350 = vmatpush1.bf16.msra.mxu0 %v3028_v60  ;;  %2382 = vmatpush1.bf16.msra.mxu1 %v3032_v63 }
 0x37f   :  { %2352 = vmatprep.subr.bf16.mxu0 %v3036_v3  ;;  %2384 = vmatprep.subr.bf16.mxu1 %v3039_v6 }
 0x382   :  { %2354 = vmatpush1.bf16.msra.mxu0 %v3042_v10  ;;  %2386 = vmatpush1.bf16.msra.mxu1 %v3046_v13 }
 0x383   :  { %2356 = vmatprep.subr.bf16.mxu0 %v3050_v16  ;;  %2388 = vmatprep.subr.bf16.mxu1 %v3053_v19 }
 0x386   :  { %2358 = vmatpush1.bf16.msra.mxu0 %v3056_v23  ;;  %2390 = vmatpush1.bf16.msra.mxu1 %v3060_v26 }
 0x387   :  { %2360 = vmatprep.subr.bf16.mxu0 %v3064_v29  ;;  %2392 = vmatprep.subr.bf16.mxu1 %v3067_v32 }
 0x38a   :  { %2362 = vmatpush1.bf16.msra.mxu0 %v3070_v36  ;;  %2394 = vmatpush1.bf16.msra.mxu1 %v3074_v40 }
 0x38b   :  { %2364 = vmatprep.subr.bf16.mxu0 %v3078_v44  ;;  %2396 = vmatprep.subr.bf16.mxu1 %v3081_v48 }
 0x38e   :  { %2366 = vmatpush1.bf16.msra.mxu0 %v3084_v54  ;;  %2398 = vmatpush1.bf16.msra.mxu1 %v3088_v58 }
 0x38f   :  { %2368 = vmatprep.subr.bf16.mxu0 %v3092_v62  ;;  %2400 = vmatprep.subr.bf16.mxu1 %v3095_v4 }
 0x392   :  { %2370 = vmatpush1.bf16.msra.mxu0 %v3098_v9  ;;  %2402 = vmatpush1.bf16.msra.mxu1 %v3102_v14 }
 0x393   :  { %2372 = vmatprep.subr.bf16.mxu0 %v3106_v18  ;;  %2404 = vmatprep.subr.bf16.mxu1 %v3109_v22 }
 0x396   :  { %2374 = vmatpush1.bf16.msra.mxu0 %v3112_v25  ;;  %2406 = vmatpush1.bf16.msra.mxu1 %v3116_v27 }
 0x397   :  { %2408 = vmatprep.subr.bf16.mxu0 %v3013_v38  ;;  %2440 = vmatprep.subr.bf16.mxu1 %v3015_v41 }
 0x44c   :  { %v1080_v24 = vpop.f32.mrb[6].mxu0  ;;  %v1151_v28 = vpop.f32.mrb[6].mxu1 }
 0x44d   :  { %v2629_v42 = vadd.f32 %v1080_v24, %v3166_v35  ;;  %v1082_v43 = vpop.f32.mrb[7].mxu0  ;;  %v1153_v45 = vpop.f32.mrb[7].mxu1  ;;  %v2645_v57 = vadd.f32 %v1151_v28, %v3175_v1 }
 0x44e   :  { %v2630_v46 = vadd.f32 %v1082_v43, %v3168_v39  ;;  %v2646_v55 = vadd.f32 %v1153_v45, %v3171_v49 }
 0x44f   :  { %v1160_v51 = vmul.f32 0.5, %v2629_v42  ;;  %v1162_v59 = vmul.f32 0.5, %v2645_v57 }
 0x450   :  { %v1161_v52 = vmul.f32 0.5, %v2630_v46 }
 0x451   :  { %2729 = vtanh.f32 %v1160_v51 }
 0x452   :  { %2731 = vtanh.f32 %v1161_v52 }
 0x453   :  { %2733 = vtanh.f32 %v2646_v55 }
 0x454   :  { %2735 = vtanh.f32 %v1162_v59 }
 0x45b   :  { %v2730_v61 = vpop.eup %2729 }
 0x45c   :  { %v1166_v2 = vadd.f32 1.0, %v2730_v61  ;;  %v2732_v5 = vpop.eup %2731 }
 0x45d   :  { %v1167_v8 = vadd.f32 1.0, %v2732_v5  ;;  %v2734_v11 = vpop.eup %2733 }
 0x45e   :  { %v1169_v7 = vmul.f32 0.5, %v1166_v2  ;;  %v2736_v30 = vpop.eup %2735 }
 0x45f   :  { %v1170_v12 = vmul.f32 0.5, %v1167_v8  ;;  %v1168_v31 = vadd.f32 1.0, %v2736_v30 }
 0x460   :  { %v1174_v15 = vmul.f32 %v2734_v11, %v1169_v7 }
 0x461   :  { %v1173_v17 = vmul.f32 %v1170_v12, %v3262_v21  ;;  %v1171_v33 = vmul.f32 0.5, %v1168_v31 }
 0x463   :  { %v3304_v20 = vadd.f32 %v1174_v15, %v1173_v17 }
 0x465   :  { %2737 = vtanh.f32 %v3304_v20 }
 0x46f   :  { %v2738_v34 = vpop.eup %2737 }
 0x470   :  { %v1177_v37 = vmul.f32 %v2738_v34, %v1171_v33 }
 0x472   :  { %1248 = vmatmul.mubr.f32.vlgmr.msra.gmra.mrb[8].mxu0 %v1177_v37  ;;  %1319 = vmatmul.mubr.f32.vlgmr.msra.gmra.mrb[8].mxu1 %v1177_v37 }
 0x473   :  { %2410 = vmatpush1.bf16.msra.mxu0 %v3017_v47  ;;  %2442 = vmatpush1.bf16.msra.mxu1 %v3020_v50 }
 0x474   :  { %2412 = vmatprep.subr.bf16.mxu0 %v3023_v53  ;;  %2444 = vmatprep.subr.bf16.mxu1 %v3025_v56 }
 0x475   :  { %1416 = vmatprep.mubr.f32.mxu0 %v2905_v0  ;;  %1487 = vmatprep.mubr.f32.mxu1 %v2905_v0 }
 0x477   :  { %2414 = vmatpush1.bf16.msra.mxu0 %v3028_v60  ;;  %2446 = vmatpush1.bf16.msra.mxu1 %v3032_v63 }
 0x478   :  { %2416 = vmatprep.subr.bf16.mxu0 %v3036_v3  ;;  %2448 = vmatprep.subr.bf16.mxu1 %v3039_v6 }
 0x47b   :  { %2418 = vmatpush1.bf16.msra.mxu0 %v3042_v10  ;;  %2450 = vmatpush1.bf16.msra.mxu1 %v3046_v13 }
 0x47c   :  { %2420 = vmatprep.subr.bf16.mxu0 %v3050_v16  ;;  %2452 = vmatprep.subr.bf16.mxu1 %v3053_v19 }
 0x47f   :  { %2422 = vmatpush1.bf16.msra.mxu0 %v3056_v23  ;;  %2454 = vmatpush1.bf16.msra.mxu1 %v3060_v26 }
 0x480   :  { %2424 = vmatprep.subr.bf16.mxu0 %v3064_v29  ;;  %2456 = vmatprep.subr.bf16.mxu1 %v3067_v32 }
 0x483   :  { %2426 = vmatpush1.bf16.msra.mxu0 %v3070_v36  ;;  %2458 = vmatpush1.bf16.msra.mxu1 %v3074_v40 }
 0x484   :  { %2428 = vmatprep.subr.bf16.mxu0 %v3078_v44  ;;  %2460 = vmatprep.subr.bf16.mxu1 %v3081_v48 }
 0x487   :  { %2430 = vmatpush1.bf16.msra.mxu0 %v3084_v54  ;;  %2462 = vmatpush1.bf16.msra.mxu1 %v3088_v58 }
 0x488   :  { %2432 = vmatprep.subr.bf16.mxu0 %v3092_v62  ;;  %2464 = vmatprep.subr.bf16.mxu1 %v3095_v4 }
 0x48b   :  { %2434 = vmatpush1.bf16.msra.mxu0 %v3098_v9  ;;  %2466 = vmatpush1.bf16.msra.mxu1 %v3102_v14 }
 0x48c   :  { %2436 = vmatprep.subr.bf16.mxu0 %v3106_v18  ;;  %2468 = vmatprep.subr.bf16.mxu1 %v3109_v22 }
 0x48f   :  { %2438 = vmatpush1.bf16.msra.mxu0 %v3112_v25  ;;  %2470 = vmatpush1.bf16.msra.mxu1 %v3116_v27 }
 0x490   :  { %2472 = vmatprep.subr.bf16.mxu0 %v3013_v38  ;;  %2504 = vmatprep.subr.bf16.mxu1 %v3015_v41 }
 0x545   :  { %v1249_v21 = vpop.f32.mrb[8].mxu0  ;;  %v1320_v24 = vpop.f32.mrb[8].mxu1 }
 0x546   :  { %v2631_v28 = vadd.f32 %v1249_v21, %v3166_v35  ;;  %v1251_v42 = vpop.f32.mrb[9].mxu0  ;;  %v1322_v43 = vpop.f32.mrb[9].mxu1  ;;  %v2647_v55 = vadd.f32 %v1320_v24, %v3175_v1 }
 0x547   :  { %v2632_v45 = vadd.f32 %v1251_v42, %v3168_v39  ;;  %v2648_v52 = vadd.f32 %v1322_v43, %v3171_v49 }
 0x548   :  { %v1329_v46 = vmul.f32 0.5, %v2631_v28  ;;  %v1331_v57 = vmul.f32 0.5, %v2647_v55 }
 0x549   :  { %v1330_v51 = vmul.f32 0.5, %v2632_v45 }
 0x54a   :  { %2739 = vtanh.f32 %v1329_v46 }
 0x54b   :  { %2741 = vtanh.f32 %v1330_v51 }
 0x54c   :  { %2743 = vtanh.f32 %v2648_v52 }
 0x54d   :  { %2745 = vtanh.f32 %v1331_v57 }
 0x554   :  { %v2740_v59 = vpop.eup %2739 }
 0x555   :  { %v1335_v61 = vadd.f32 1.0, %v2740_v59  ;;  %v2742_v2 = vpop.eup %2741 }
 0x556   :  { %v1336_v7 = vadd.f32 1.0, %v2742_v2  ;;  %v2744_v8 = vpop.eup %2743 }
 0x557   :  { %v1338_v5 = vmul.f32 0.5, %v1335_v61  ;;  %v2746_v30 = vpop.eup %2745 }
 0x558   :  { %v1339_v11 = vmul.f32 0.5, %v1336_v7  ;;  %v1337_v31 = vadd.f32 1.0, %v2746_v30 }
 0x559   :  { %v1343_v12 = vmul.f32 %v2744_v8, %v1338_v5 }
 0x55a   :  { %v1342_v15 = vmul.f32 %v1339_v11, %v3304_v20  ;;  %v1340_v33 = vmul.f32 0.5, %v1337_v31 }
 0x55c   :  { %v3346_v17 = vadd.f32 %v1343_v12, %v1342_v15 }
 0x55e   :  { %2747 = vtanh.f32 %v3346_v17 }
 0x568   :  { %v2748_v34 = vpop.eup %2747 }
 0x569   :  { %v1346_v37 = vmul.f32 %v2748_v34, %v1340_v33  ;;  %v1862_v34 = vld [vmem:[#allocation11 + $0x18] sm:$0xff] }
 0x56b   :  { %1417 = vmatmul.mubr.f32.vlgmr.msra.gmra.mrb[10].mxu0 %v1346_v37  ;;  %1488 = vmatmul.mubr.f32.vlgmr.msra.gmra.mrb[10].mxu1 %v1346_v37 }
 0x56c   :  { %2474 = vmatpush1.bf16.msra.mxu0 %v3017_v47  ;;  %2506 = vmatpush1.bf16.msra.mxu1 %v3020_v50 }
 0x56d   :  { %2476 = vmatprep.subr.bf16.mxu0 %v3023_v53  ;;  %2508 = vmatprep.subr.bf16.mxu1 %v3025_v56 }
 0x56e   :  { %1585 = vmatprep.mubr.f32.mxu0 %v2905_v0  ;;  %1656 = vmatprep.mubr.f32.mxu1 %v2905_v0 }
 0x570   :  { %2478 = vmatpush1.bf16.msra.mxu0 %v3028_v60  ;;  %2510 = vmatpush1.bf16.msra.mxu1 %v3032_v63 }
 0x571   :  { %2480 = vmatprep.subr.bf16.mxu0 %v3036_v3  ;;  %2512 = vmatprep.subr.bf16.mxu1 %v3039_v6 }
 0x574   :  { %2482 = vmatpush1.bf16.msra.mxu0 %v3042_v10  ;;  %2514 = vmatpush1.bf16.msra.mxu1 %v3046_v13 }
 0x575   :  { %2484 = vmatprep.subr.bf16.mxu0 %v3050_v16  ;;  %2516 = vmatprep.subr.bf16.mxu1 %v3053_v19 }
 0x578   :  { %2486 = vmatpush1.bf16.msra.mxu0 %v3056_v23  ;;  %2518 = vmatpush1.bf16.msra.mxu1 %v3060_v26 }
 0x579   :  { %2488 = vmatprep.subr.bf16.mxu0 %v3064_v29  ;;  %2520 = vmatprep.subr.bf16.mxu1 %v3067_v32 }
 0x57c   :  { %2490 = vmatpush1.bf16.msra.mxu0 %v3070_v36  ;;  %2522 = vmatpush1.bf16.msra.mxu1 %v3074_v40 }
 0x57d   :  { %2492 = vmatprep.subr.bf16.mxu0 %v3078_v44  ;;  %2524 = vmatprep.subr.bf16.mxu1 %v3081_v48 }
 0x580   :  { %2494 = vmatpush1.bf16.msra.mxu0 %v3084_v54  ;;  %2526 = vmatpush1.bf16.msra.mxu1 %v3088_v58 }
 0x581   :  { %2496 = vmatprep.subr.bf16.mxu0 %v3092_v62  ;;  %2528 = vmatprep.subr.bf16.mxu1 %v3095_v4 }
 0x584   :  { %2498 = vmatpush1.bf16.msra.mxu0 %v3098_v9  ;;  %2530 = vmatpush1.bf16.msra.mxu1 %v3102_v14 }
 0x585   :  { %2500 = vmatprep.subr.bf16.mxu0 %v3106_v18  ;;  %2532 = vmatprep.subr.bf16.mxu1 %v3109_v22 }
 0x588   :  { %2502 = vmatpush1.bf16.msra.mxu0 %v3112_v25  ;;  %2534 = vmatpush1.bf16.msra.mxu1 %v3116_v27 }
 0x589   :  { %2536 = vmatprep.subr.bf16.mxu0 %v3013_v38  ;;  %2568 = vmatprep.subr.bf16.mxu1 %v3015_v41 }
 0x63e   :  { %v1418_v20 = vpop.f32.mrb[10].mxu0  ;;  %v1489_v21 = vpop.f32.mrb[10].mxu1 }
 0x63f   :  { %v2633_v24 = vadd.f32 %v1418_v20, %v3166_v35  ;;  %v1420_v28 = vpop.f32.mrb[11].mxu0  ;;  %v1491_v42 = vpop.f32.mrb[11].mxu1  ;;  %v2649_v52 = vadd.f32 %v1489_v21, %v3175_v1  ;;  %v1863_v20 = vld [vmem:[#allocation11 + $0x20] sm:$0xff]  ;;  %v1864_v21 = vld [vmem:[#allocation11 + $0x28] sm:$0xff] }
 0x640   :  { %v2634_v43 = vadd.f32 %v1420_v28, %v3168_v39  ;;  %v2650_v51 = vadd.f32 %v1491_v42, %v3171_v49  ;;  %v1865_v28 = vld [vmem:[#allocation11 + $0x30] sm:$0xff]  ;;  %v1866_v42 = vld [vmem:[#allocation11 + $0x38] sm:$0xff] }
 0x641   :  { %v1498_v45 = vmul.f32 0.5, %v2633_v24  ;;  %v1500_v38 = vmul.f32 0.5, %v2649_v52  ;;  %v2606_v24 = vpack.c.bf16 %v1864_v21, %v1863_v20  ;;  %v1869_v52 = vld [vmem:[#allocation11 + $0x50] sm:$0xff] }
 0x642   :  { %v1499_v46 = vmul.f32 0.5, %v2634_v43  ;;  %v2609_v43 = vpack.c.bf16 %v1866_v42, %v1865_v28 }
 0x643   :  { %2749 = vtanh.f32 %v1498_v45  ;;  %v1867_v45 = vld [vmem:[#allocation11 + $0x40] sm:$0xff] }
 0x644   :  { %2751 = vtanh.f32 %v1499_v46  ;;  %v1868_v46 = vld [vmem:[#allocation11 + $0x48] sm:$0xff] }
 0x645   :  { %2753 = vtanh.f32 %v2650_v51  ;;  %v2612_v51 = vpack.c.bf16 %v1868_v46, %v1867_v45 }
 0x646   :  { %2755 = vtanh.f32 %v1500_v38  ;;  %v1870_v38 = vld [vmem:[#allocation11 + $0x58] sm:$0xff] }
 0x64d   :  { %v2750_v55 = vpop.eup %2749 }
 0x64e   :  { %v1504_v41 = vadd.f32 1.0, %v2750_v55  ;;  %v2752_v57 = vpop.eup %2751  ;;  %v2615_v55 = vpack.c.bf16 %v1870_v38, %v1869_v52 }
 0x64f   :  { %v1505_v61 = vadd.f32 1.0, %v2752_v57  ;;  %v2754_v2 = vpop.eup %2753  ;;  %v1872_v57 = vld [vmem:[#allocation11 + $0x68] sm:$0xff] }
 0x650   :  { %v1507_v59 = vmul.f32 0.5, %v1504_v41  ;;  %v2756_v12 = vpop.eup %2755  ;;  %v1871_v41 = vld [vmem:[#allocation11 + $0x60] sm:$0xff] }
 0x651   :  { %v1508_v5 = vmul.f32 0.5, %v1505_v61  ;;  %v1506_v15 = vadd.f32 1.0, %v2756_v12  ;;  %v1873_v61 = vld [vmem:[#allocation11 + $0x70] sm:$0xff] }
 0x652   :  { %v1512_v7 = vmul.f32 %v2754_v2, %v1507_v59  ;;  %v2618_v59 = vpack.c.bf16 %v1872_v57, %v1871_v41  ;;  %v1874_v2 = vld [vmem:[#allocation11 + $0x78] sm:$0xff] }
 0x653   :  { %v1511_v8 = vmul.f32 %v1508_v5, %v3346_v17  ;;  %v1509_v30 = vmul.f32 0.5, %v1506_v15  ;;  %v1861_v17 = vld [vmem:[#allocation11 + $0x10] sm:$0xff]  ;;  %v2621_v5 = vpack.c.bf16 %v1874_v2, %v1873_v61 }
 0x654   :  { %v2603_v37 = vpack.c.bf16 %v1862_v34, %v1861_v17 }
 0x655   :  { %v3388_v11 = vadd.f32 %v1512_v7, %v1511_v8 }
 0x657   :  { %2757 = vtanh.f32 %v3388_v11 }
 0x661   :  { %v2758_v31 = vpop.eup %2757 }
 0x662   :  { %v1515_v33 = vmul.f32 %v2758_v31, %v1509_v30 }
 0x664   :  { %1586 = vmatmul.mubr.f32.vlgmr.msra.gmra.mrb[12].mxu0 %v1515_v33  ;;  %1657 = vmatmul.mubr.f32.vlgmr.msra.gmra.mrb[12].mxu1 %v1515_v33 }
 0x665   :  { %2538 = vmatpush1.bf16.msra.mxu0 %v3017_v47  ;;  %2570 = vmatpush1.bf16.msra.mxu1 %v3020_v50 }
 0x666   :  { %2540 = vmatprep.subr.bf16.mxu0 %v3023_v53  ;;  %2572 = vmatprep.subr.bf16.mxu1 %v3025_v56 }
 0x667   :  { %1754 = vmatprep.mubr.f32.mxu0 %v2905_v0  ;;  %1825 = vmatprep.mubr.f32.mxu1 %v2905_v0 }
 0x669   :  { %2542 = vmatpush1.bf16.msra.mxu0 %v3028_v60  ;;  %2574 = vmatpush1.bf16.msra.mxu1 %v3032_v63 }
 0x66a   :  { %2544 = vmatprep.subr.bf16.mxu0 %v3036_v3  ;;  %2576 = vmatprep.subr.bf16.mxu1 %v3039_v6 }
 0x66d   :  { %2546 = vmatpush1.bf16.msra.mxu0 %v3042_v10  ;;  %2578 = vmatpush1.bf16.msra.mxu1 %v3046_v13 }
 0x66e   :  { %2548 = vmatprep.subr.bf16.mxu0 %v3050_v16  ;;  %2580 = vmatprep.subr.bf16.mxu1 %v3053_v19 }
 0x671   :  { %2550 = vmatpush1.bf16.msra.mxu0 %v3056_v23  ;;  %2582 = vmatpush1.bf16.msra.mxu1 %v3060_v26 }
 0x672   :  { %2552 = vmatprep.subr.bf16.mxu0 %v3064_v29  ;;  %2584 = vmatprep.subr.bf16.mxu1 %v3067_v32 }
 0x675   :  { %2554 = vmatpush1.bf16.msra.mxu0 %v3070_v36  ;;  %2586 = vmatpush1.bf16.msra.mxu1 %v3074_v40 }
 0x676   :  { %2556 = vmatprep.subr.bf16.mxu0 %v3078_v44  ;;  %2588 = vmatprep.subr.bf16.mxu1 %v3081_v48 }
 0x679   :  { %2558 = vmatpush1.bf16.msra.mxu0 %v3084_v54  ;;  %2590 = vmatpush1.bf16.msra.mxu1 %v3088_v58 }
 0x67a   :  { %2560 = vmatprep.subr.bf16.mxu0 %v3092_v62  ;;  %2592 = vmatprep.subr.bf16.mxu1 %v3095_v4 }
 0x67d   :  { %2562 = vmatpush1.bf16.msra.mxu0 %v3098_v9  ;;  %2594 = vmatpush1.bf16.msra.mxu1 %v3102_v14 }
 0x67e   :  { %2564 = vmatprep.subr.bf16.mxu0 %v3106_v18  ;;  %2596 = vmatprep.subr.bf16.mxu1 %v3109_v22  ;;  %v1859_v18 = vld [vmem:[#allocation11] sm:$0xff]  ;;  %v1860_v22 = vld [vmem:[#allocation11 + $0x8] sm:$0xff] }
 0x681   :  { %2566 = vmatpush1.bf16.msra.mxu0 %v3112_v25  ;;  %2598 = vmatpush1.bf16.msra.mxu1 %v3116_v27  ;;  %v2600_v25 = vpack.c.bf16 %v1860_v22, %v1859_v18  ;;  %v2906_v27 = vmov 0.0|0.0  }
 0x682   :  { %2599 = vmatprep.subr.bf16.mxu0 %v2906_v27 }
 0x737   :  { %v1587_v47 = vpop.f32.mrb[12].mxu0  ;;  %v1658_v50 = vpop.f32.mrb[12].mxu1 }
 0x738   :  { %v2635_v53 = vadd.f32 %v1587_v47, %v3166_v35  ;;  %v1589_v56 = vpop.f32.mrb[13].mxu0  ;;  %v1660_v60 = vpop.f32.mrb[13].mxu1  ;;  %v2651_v13 = vadd.f32 %v1658_v50, %v3175_v1 }
 0x739   :  { %v2636_v63 = vadd.f32 %v1589_v56, %v3168_v39  ;;  %v2652_v10 = vadd.f32 %v1660_v60, %v3171_v49 }
 0x73a   :  { %v1667_v3 = vmul.f32 0.5, %v2635_v53  ;;  %v1669_v16 = vmul.f32 0.5, %v2651_v13 }
 0x73b   :  { %v1668_v6 = vmul.f32 0.5, %v2636_v63 }
 0x73c   :  { %2759 = vtanh.f32 %v1667_v3 }
 0x73d   :  { %2761 = vtanh.f32 %v1668_v6 }
 0x73e   :  { %2763 = vtanh.f32 %v2652_v10 }
 0x73f   :  { %2765 = vtanh.f32 %v1669_v16 }
 0x746   :  { %v2760_v19 = vpop.eup %2759 }
 0x747   :  { %v1673_v23 = vadd.f32 1.0, %v2760_v19  ;;  %v2762_v26 = vpop.eup %2761 }
 0x748   :  { %v1674_v32 = vadd.f32 1.0, %v2762_v26  ;;  %v2764_v36 = vpop.eup %2763 }
 0x749   :  { %v1676_v29 = vmul.f32 0.5, %v1673_v23  ;;  %v2766_v58 = vpop.eup %2765 }
 0x74a   :  { %v1677_v40 = vmul.f32 0.5, %v1674_v32  ;;  %v1675_v62 = vadd.f32 1.0, %v2766_v58 }
 0x74b   :  { %v1681_v44 = vmul.f32 %v2764_v36, %v1676_v29 }
 0x74c   :  { %v1680_v48 = vmul.f32 %v1677_v40, %v3388_v11  ;;  %v1678_v4 = vmul.f32 0.5, %v1675_v62 }
 0x74e   :  { %v3428_v54 = vadd.f32 %v1681_v44, %v1680_v48 }
 0x750   :  { %2767 = vtanh.f32 %v3428_v54 }
 0x75a   :  { %v2768_v9 = vpop.eup %2767 }
 0x75b   :  { %v1684_v14 = vmul.f32 %v2768_v9, %v1678_v4 }
 0x75d   :  { %1755 = vmatmul.mubr.f32.vlgmr.msra.gmra.mrb[14].mxu0 %v1684_v14  ;;  %1826 = vmatmul.mubr.f32.vlgmr.msra.gmra.mrb[14].mxu1 %v1684_v14 }
 0x75e   :  { %2601 = vmatpush3.bf16.msra.mxu0 %v2600_v25  ;;  %2020 = vmatprep.mubr.msk.f32.mxu0 %vm2907_vm0, %v2905_v0 }
 0x75f   :  { %2602 = vmatprep.subr.bf16.mxu0 %v2906_v27 }
 0x762   :  { %2604 = vmatpush3.bf16.msra.mxu0 %v2603_v37 }
 0x763   :  { %2605 = vmatprep.subr.bf16.mxu0 %v2906_v27 }
 0x766   :  { %2607 = vmatpush3.bf16.msra.mxu0 %v2606_v24 }
 0x767   :  { %2608 = vmatprep.subr.bf16.mxu0 %v2906_v27 }
 0x76a   :  { %2610 = vmatpush3.bf16.msra.mxu0 %v2609_v43 }
 0x76b   :  { %2611 = vmatprep.subr.bf16.mxu0 %v2906_v27 }
 0x76e   :  { %2613 = vmatpush3.bf16.msra.mxu0 %v2612_v51 }
 0x76f   :  { %2614 = vmatprep.subr.bf16.mxu0 %v2906_v27 }
 0x772   :  { %2616 = vmatpush3.bf16.msra.mxu0 %v2615_v55 }
 0x773   :  { %2617 = vmatprep.subr.bf16.mxu0 %v2906_v27 }
 0x776   :  { %2619 = vmatpush3.bf16.msra.mxu0 %v2618_v59 }
 0x777   :  { %2620 = vmatprep.subr.bf16.mxu0 %v2906_v27 }
 0x77a   :  { %2622 = vmatpush3.bf16.msra.mxu0 %v2621_v5 }
 0x830   :  { %v1756_v7 = vpop.f32.mrb[14].mxu0  ;;  %v1827_v8 = vpop.f32.mrb[14].mxu1 }
 0x831   :  { %v2637_v11 = vadd.f32 %v1756_v7, %v3166_v35  ;;  %v1758_v12 = vpop.f32.mrb[15].mxu0  ;;  %v1829_v15 = vpop.f32.mrb[15].mxu1  ;;  %v2653_v47 = vadd.f32 %v1827_v8, %v3175_v1  ;;  %v1970_v1 = vld [vmem:[%s3457_s5] ss:$0 sm:$0xff] }
 0x832   :  { %v2638_v30 = vadd.f32 %v1758_v12, %v3168_v39  ;;  %v2654_v0 = vadd.f32 %v1829_v15, %v3171_v49 }
 0x833   :  { %v1836_v31 = vmul.f32 0.5, %v2637_v11  ;;  %v1838_v50 = vmul.f32 0.5, %v2653_v47 }
 0x834   :  { %v1837_v33 = vmul.f32 0.5, %v2638_v30 }
 0x835   :  { %2769 = vtanh.f32 %v1836_v31 }
 0x836   :  { %2771 = vtanh.f32 %v1837_v33 }
 0x837   :  { %2773 = vtanh.f32 %v2654_v0 }
 0x838   :  { %2775 = vtanh.f32 %v1838_v50 }
 0x83f   :  { %v2770_v53 = vpop.eup %2769 }
 0x840   :  { %v1842_v56 = vadd.f32 1.0, %v2770_v53  ;;  %v2772_v60 = vpop.eup %2771 }
 0x841   :  { %v1843_v35 = vadd.f32 1.0, %v2772_v60  ;;  %v2774_v3 = vpop.eup %2773 }
 0x842   :  { %v1845_v63 = vmul.f32 0.5, %v1842_v56  ;;  %v2776_v16 = vpop.eup %2775 }
 0x843   :  { %v1846_v6 = vmul.f32 0.5, %v1843_v35  ;;  %v1844_v49 = vadd.f32 1.0, %v2776_v16 }
 0x844   :  { %v1850_v10 = vmul.f32 %v2774_v3, %v1845_v63 }
 0x845   :  { %v1849_v39 = vmul.f32 %v1846_v6, %v3428_v54  ;;  %v1847_v19 = vmul.f32 0.5, %v1844_v49 }
 0x847   :  { %v1851_v13 = vadd.f32 %v1850_v10, %v1849_v39 }
 0x849   :  { %2777 = vtanh.f32 %v1851_v13 }
 0x853   :  { %v2778_v23 = vpop.eup %2777 }
 0x854   :  { %v1853_v26 = vmul.f32 %v2778_v23, %v1847_v19 }
 0x856   :  { %2021 = vmatmul.mubr.f32.vlgmr.msra.gmra.mrb[16].mxu0 %v1853_v26 }
 0x929   :  { %v1948_v29 = vpop.f32.mrb[16].mxu0 }
 0x92a   :  { %v1949_v32 = vadd.f32 %v1970_v1, %v1948_v29  ;;  %v2022_v36 = vpop.f32.mrb[17].mxu0 }
 0x92c   :  { %1952 = vst [vmem:[#allocation13] sm:$0xff] %v1949_v32 }
 0x92d   :  { %2878 = shalt.err (!%p2875_p8)
}
 0x92e   :  { %s2879_s28 = scalar_lea.hbm %s3458_s6, 128 }
 0x92f   :  { %p2880_p9 = scmp.ne.s32.totalorder %s3458_s6, %s2879_s28  ;;  %p2883_p10 = scmp.lt.u32.totalorder %s2879_s28, %s3458_s6 }
 0x931   :  { %p2885_p11 = pnand %p2883_p10, %p2880_p9 }
 0x933   :  { %2888 = shalt.err (!%p2885_p11)
}
 0x934   :  { %1962 = dma.vmem_to_hbm [thread:$0]  %s1960_s24, 128, %s3458_s6, [#allocation7]  }
 0x935   :  { %2895 = dma.done.wait [#allocation7], 128  }
 0x936   :  { %2896 = vsyncadd [#allocation7], 4294967168 }
 0x937   :  { %1966 = vsyncpa [#allocation6], 1 }
 0x938   :  { %1967 = vsyncpa [#allocation9], 1 }
 0x939   :  { %1968 = vsyncpa [#allocation12], 1 }
 0x93a   :  { %1969 = vsyncpa [#allocation7], 1 }

</bundles_post_ra>
